<compile_context>
chip_gen: v6e
topology: v6e:2x2x1
jax: 0.10.0
libtpu: 0.0.40
codegen_flags: <defaults>
</compile_context>

<pallas_src>
import math
import functools

import jax
import jax.numpy as jnp
from jax.experimental import pallas as pl
from jax.experimental.pallas import tpu as pltpu


# Order of the layer-stacked weight arrays as passed to the kernel.
LAYER_KEYS = (
    'wq_s', 'wk_s', 'wv_s', 'bq_s', 'bk_s', 'bv_s', 'wo_s', 'bo_s',
    'ln1_g', 'ln1_b',
    'wq_c', 'wk_c', 'wv_c', 'bq_c', 'bk_c', 'bv_c', 'wo_c', 'bo_c',
    'ln2_g', 'ln2_b',
    'w1', 'b1', 'w2', 'b2', 'ln3_g', 'ln3_b',
)


# --------------------------- in-kernel helpers ------------------------------

def _layernorm(x, g, b, eps):
    """LayerNorm over last dim, biased variance (matches PyTorch)."""
    mu = jnp.mean(x, axis=-1, keepdims=True)
    xc = x - mu
    var = jnp.mean(xc * xc, axis=-1, keepdims=True)
    return xc * jax.lax.rsqrt(var + eps) * g + b


# --------------------------- fused transformer kernel -----------------------

def _fused_decoder_kernel(
    mem_ref,                                               # (S, D)  f32
    wq_s_ref, wk_s_ref, wv_s_ref,                          # (H, D, Dh) bf16
    bq_s_ref, bk_s_ref, bv_s_ref,                          # (H, 1, Dh) f32
    wo_s_ref, bo_s_ref,                                    # (H, Dh, D) bf16, (1, D) f32
    ln1_g_ref, ln1_b_ref,                                  # (1, D) f32
    wq_c_ref, wk_c_ref, wv_c_ref,
    bq_c_ref, bk_c_ref, bv_c_ref,
    wo_c_ref, bo_c_ref,
    ln2_g_ref, ln2_b_ref,
    w1_ref, b1_ref, w2_ref, b2_ref,                        # FFN
    ln3_g_ref, ln3_b_ref,
    out_w_ref, out_b_ref,                                  # (D, Vp) bf16, (1, Vp) f32
    logits_ref,                                            # out: (S, Vp) f32
    x_vmem,                                                # scratch: (S, D) f32
    *, nhead, eps):
    layer = pl.program_id(1)

    @pl.when(layer == 0)
    def _init():
        # tgt starts as the pos-encoded src (== memory) for this batch element.
        x_vmem[...] = mem_ref[...]

    x = x_vmem[...]                                        # (S, D) f32, residual stream
    mem = mem_ref[...]                                     # (S, D) f32, constant memory
    seq, d_model = x.shape
    head_dim = d_model // nhead
    scale = 1.0 / math.sqrt(head_dim)

    def mha(xq, xkv, wq, bq, wk, bk, wv, bv, wo, bo):
        """Multi-head attention: head-batched matmuls, head merge folded into
        the out-projection (concat(o_h) @ Wo == sum_h o_h @ Wo_h)."""
        sq, sk = xq.shape[0], xkv.shape[0]
        xq_h = jnp.broadcast_to(xq.astype(jnp.bfloat16)[None], (nhead, sq, d_model))
        xkv_h = jnp.broadcast_to(xkv.astype(jnp.bfloat16)[None], (nhead, sk, d_model))
        q = jnp.einsum('hsd,hde->hse', xq_h, wq[...],
                       preferred_element_type=jnp.float32) + bq[...]
        k = jnp.einsum('hsd,hde->hse', xkv_h, wk[...],
                       preferred_element_type=jnp.float32) + bk[...]
        v = jnp.einsum('hsd,hde->hse', xkv_h, wv[...],
                       preferred_element_type=jnp.float32) + bv[...]
        s = jnp.einsum('hqe,hke->hqk', q.astype(jnp.bfloat16), k.astype(jnp.bfloat16),
                       preferred_element_type=jnp.float32) * scale
        s = s - jnp.max(s, axis=-1, keepdims=True)
        p = jnp.exp(s)
        p = p * pl.reciprocal(jnp.sum(p, axis=-1, keepdims=True), approx=True)
        o = jnp.einsum('hqk,hke->hqe', p.astype(jnp.bfloat16), v.astype(jnp.bfloat16),
                       preferred_element_type=jnp.float32)       # (H, Sq, Dh)
        oc = jnp.einsum('hqe,hed->hqd', o.astype(jnp.bfloat16), wo[...],
                        preferred_element_type=jnp.float32)      # (H, Sq, D)
        return jnp.sum(oc, axis=0) + bo[...]                     # (Sq, D)

    # ---- self-attention + residual + LayerNorm1 (post-norm) ----
    sa = mha(x, x, wq_s_ref, bq_s_ref, wk_s_ref, bk_s_ref, wv_s_ref, bv_s_ref,
             wo_s_ref, bo_s_ref)
    x = _layernorm(x + sa, ln1_g_ref[...], ln1_b_ref[...], eps)

    # ---- cross-attention over memory + residual + LayerNorm2 ----
    ca = mha(x, mem, wq_c_ref, bq_c_ref, wk_c_ref, bk_c_ref, wv_c_ref, bv_c_ref,
             wo_c_ref, bo_c_ref)
    x = _layernorm(x + ca, ln2_g_ref[...], ln2_b_ref[...], eps)

    # ---- feed-forward (ReLU) + residual + LayerNorm3 ----
    hid = jnp.maximum(
        jnp.dot(x.astype(jnp.bfloat16), w1_ref[...],
                preferred_element_type=jnp.float32) + b1_ref[...], 0.0)
    ff = jnp.dot(hid.astype(jnp.bfloat16), w2_ref[...],
                 preferred_element_type=jnp.float32) + b2_ref[...]
    x = _layernorm(x + ff, ln3_g_ref[...], ln3_b_ref[...], eps)

    x_vmem[...] = x

    # ---- vocab projection fused into the last layer step (lane-dense Vp) ----
    @pl.when(layer == pl.num_programs(1) - 1)
    def _final():
        logits_ref[...] = (jnp.dot(x.astype(jnp.bfloat16), out_w_ref[...],
                                   preferred_element_type=jnp.float32)
                           + out_b_ref[...])
    # TODO(synk): tgt_mask / tgt_key_padding_mask paths not implemented
    # (reference forward is called with their default None).


# --------------------------- model composition ------------------------------

def floorplan_transformer_forward(params, src, *, nhead):
    """src: (batch, seq) int32 token ids -> (batch, seq, vocab) float32 logits."""
    B, S = src.shape
    vocab = params['embedding'].shape[0]
    D = params['embedding'].shape[1]
    st = params['stack']
    L = st['wq_s'].shape[0]
    H = nhead
    Dh = D // H
    Hid = st['w1'].shape[2]
    Vp = params['out_w_p'].shape[1]
    M = B * S

    # Embedding gather + sqrt(d_model) scale + positional encoding (JAX glue;
    # dropout is identity in eval mode).  Batch-major rows (B*S, D).
    emb = jnp.take(params['embedding'], src, axis=0)             # (B, S, D)
    pe = params['pe'][:S, 0, :]                                  # (S, D)
    x = (emb * math.sqrt(D) + pe[None, :, :]).reshape(M, D).astype(jnp.float32)

    layer_arrays = [st[k] for k in LAYER_KEYS]
    const_arrays = [params['out_w_p'], params['out_b_p']]

    def layer_spec(a):
        nd = a.ndim
        return pl.BlockSpec((None,) + a.shape[1:],
                            lambda b, l, _nd=nd: (l,) + (0,) * (_nd - 1))

    def const_spec(a):
        nd = a.ndim
        return pl.BlockSpec(a.shape, lambda b, l, _nd=nd: (0,) * _nd)

    in_specs = ([pl.BlockSpec((S, D), lambda b, l: (b, 0))]      # memory / initial x
                + [layer_spec(a) for a in layer_arrays]
                + [const_spec(a) for a in const_arrays])

    grid_spec = pltpu.PrefetchScalarGridSpec(
        num_scalar_prefetch=0,
        grid=(B, L),                                             # batch x layers
        in_specs=in_specs,
        out_specs=pl.BlockSpec((S, Vp), lambda b, l: (b, 0)),
        scratch_shapes=[pltpu.VMEM((S, D), jnp.float32)],        # resident activations
    )

    flops = int(L * (2 * M * D * D * 8 + 2 * M * D * Hid * 2
                     + 2 * 2 * B * H * S * S * Dh * 2)
                + 2 * M * D * Vp)
    transcendentals = int(L * (2 * B * H * S * S + 3 * M))
    bytes_accessed = int(x.size * 4 + M * Vp * 4
                         + B * sum(a.size * a.dtype.itemsize
                                   for a in layer_arrays + const_arrays))

    logits_p = pl.pallas_call(
        functools.partial(_fused_decoder_kernel, nhead=nhead, eps=1e-5),
        out_shape=jax.ShapeDtypeStruct((M, Vp), jnp.float32),
        grid_spec=grid_spec,
        compiler_params=pltpu.CompilerParams(
            dimension_semantics=("parallel", "arbitrary"),       # batch axis -> 2nd TC on v7x
            vmem_limit_bytes=32 * 1024 * 1024),
        cost_estimate=pl.CostEstimate(flops=flops,
                                      transcendentals=transcendentals,
                                      bytes_accessed=bytes_accessed),
    )(x, *layer_arrays, *const_arrays)

    return logits_p[:, :vocab].reshape(B, S, vocab)


# --------------------------- parameters -------------------------------------

def positional_encoding(max_len, d_model):
    position = jnp.arange(max_len, dtype=jnp.float32)[:, None]
    div_term = jnp.exp(jnp.arange(0, d_model, 2, dtype=jnp.float32)
                       * (-math.log(10000.0) / d_model))
    pe = jnp.zeros((max_len, 1, d_model), jnp.float32)
    pe = pe.at[:, 0, 0::2].set(jnp.sin(position * div_term))
    pe = pe.at[:, 0, 1::2].set(jnp.cos(position * div_term))
    return pe


def init_params(key, vocab_size, d_model, nhead, d_hid, nlayers, max_seq_len):
    """Weights are built once in the exact layout the fused kernel consumes:
    layer-stacked, head-major, bf16 GEMM operands, lane-padded vocab."""
    assert d_model % nhead == 0
    head_dim = d_model // nhead
    L = nlayers
    keys = iter(jax.random.split(key, 16))

    def w(shape, scale=0.05):
        return (scale * jax.random.normal(next(keys), shape)).astype(jnp.float32)

    def head_major(wt):            # (L, D, D) -> (L, H, D, Dh), bf16
        return (wt.reshape(L, d_model, nhead, head_dim)
                  .transpose(0, 2, 1, 3).astype(jnp.bfloat16))

    def out_head_major(wt):        # (L, D, D) -> (L, H, Dh, D), bf16
        return wt.reshape(L, nhead, head_dim, d_model).astype(jnp.bfloat16)

    zeros_hd = jnp.zeros((L, nhead, 1, head_dim), jnp.float32)
    zeros_d = jnp.zeros((L, 1, d_model), jnp.float32)
    ones_d = jnp.ones((L, 1, d_model), jnp.float32)

    stack = dict(
        wq_s=head_major(w((L, d_model, d_model))),
        wk_s=head_major(w((L, d_model, d_model))),
        wv_s=head_major(w((L, d_model, d_model))),
        bq_s=zeros_hd, bk_s=zeros_hd, bv_s=zeros_hd,
        wo_s=out_head_major(w((L, d_model, d_model))),
        bo_s=zeros_d, ln1_g=ones_d, ln1_b=zeros_d,
        wq_c=head_major(w((L, d_model, d_model))),
        wk_c=head_major(w((L, d_model, d_model))),
        wv_c=head_major(w((L, d_model, d_model))),
        bq_c=zeros_hd, bk_c=zeros_hd, bv_c=zeros_hd,
        wo_c=out_head_major(w((L, d_model, d_model))),
        bo_c=zeros_d, ln2_g=ones_d, ln2_b=zeros_d,
        w1=w((L, d_model, d_hid)).astype(jnp.bfloat16),
        b1=jnp.zeros((L, 1, d_hid), jnp.float32),
        w2=w((L, d_hid, d_model)).astype(jnp.bfloat16),
        b2=zeros_d, ln3_g=ones_d, ln3_b=zeros_d,
    )

    vocab_padded = max(128, ((vocab_size + 127) // 128) * 128)   # lane-dense logits
    out_w = w((d_model, vocab_size))
    out_w_p = jnp.zeros((d_model, vocab_padded), jnp.float32).at[:, :vocab_size].set(out_w)

    return dict(
        embedding=w((vocab_size, d_model), 1.0),
        pe=positional_encoding(max_seq_len, d_model),
        stack=stack,
        out_w_p=out_w_p.astype(jnp.bfloat16),
        out_b_p=jnp.zeros((1, vocab_padded), jnp.float32),
    )


# --------------------------- driver ------------------------------------------

if __name__ == "__main__":
    vocab_size = 32
    d_model = 32
    nhead = 4
    d_hid = 64
    nlayers = 2
    max_seq_len = 64
    batch, seq = 2, 8

    key = jax.random.PRNGKey(0)
    pkey, dkey = jax.random.split(key)
    params = init_params(pkey, vocab_size, d_model, nhead, d_hid, nlayers, max_seq_len)
    src = jax.random.randint(dkey, (batch, seq), 0, vocab_size, dtype=jnp.int32)

    fwd = jax.jit(functools.partial(floorplan_transformer_forward, nhead=nhead))
    out = fwd(params, src)
    out = jax.block_until_ready(out)

    assert out.shape == (batch, seq, vocab_size), out.shape
    assert bool(jnp.all(jnp.isfinite(out)))
    print("KERNEL_OK")
</pallas_src>

<mosaic_0001>
module attributes {stable_mosaic.version = 11 : i64} {
  func.func @_fused_decoder_kernel(%arg0: i32, %arg1: i32, %arg2: memref<8x32xf32, #tpu.memory_space<vmem>>, %arg3: memref<1x4x32x8xbf16, #tpu.memory_space<vmem>>, %arg4: memref<1x4x32x8xbf16, #tpu.memory_space<vmem>>, %arg5: memref<1x4x32x8xbf16, #tpu.memory_space<vmem>>, %arg6: memref<1x4x1x8xf32, #tpu.memory_space<vmem>>, %arg7: memref<1x4x1x8xf32, #tpu.memory_space<vmem>>, %arg8: memref<1x4x1x8xf32, #tpu.memory_space<vmem>>, %arg9: memref<1x4x8x32xbf16, #tpu.memory_space<vmem>>, %arg10: memref<1x1x32xf32, #tpu.memory_space<vmem>>, %arg11: memref<1x1x32xf32, #tpu.memory_space<vmem>>, %arg12: memref<1x1x32xf32, #tpu.memory_space<vmem>>, %arg13: memref<1x4x32x8xbf16, #tpu.memory_space<vmem>>, %arg14: memref<1x4x32x8xbf16, #tpu.memory_space<vmem>>, %arg15: memref<1x4x32x8xbf16, #tpu.memory_space<vmem>>, %arg16: memref<1x4x1x8xf32, #tpu.memory_space<vmem>>, %arg17: memref<1x4x1x8xf32, #tpu.memory_space<vmem>>, %arg18: memref<1x4x1x8xf32, #tpu.memory_space<vmem>>, %arg19: memref<1x4x8x32xbf16, #tpu.memory_space<vmem>>, %arg20: memref<1x1x32xf32, #tpu.memory_space<vmem>>, %arg21: memref<1x1x32xf32, #tpu.memory_space<vmem>>, %arg22: memref<1x1x32xf32, #tpu.memory_space<vmem>>, %arg23: memref<1x32x64xbf16, #tpu.memory_space<vmem>>, %arg24: memref<1x1x64xf32, #tpu.memory_space<vmem>>, %arg25: memref<1x64x32xbf16, #tpu.memory_space<vmem>>, %arg26: memref<1x1x32xf32, #tpu.memory_space<vmem>>, %arg27: memref<1x1x32xf32, #tpu.memory_space<vmem>>, %arg28: memref<1x1x32xf32, #tpu.memory_space<vmem>>, %arg29: memref<32x128xbf16, #tpu.memory_space<vmem>>, %arg30: memref<1x128xf32, #tpu.memory_space<vmem>>, %arg31: memref<8x128xf32, #tpu.memory_space<vmem>>, %arg32: memref<8x32xf32, #tpu.memory_space<vmem>>) attributes {dimension_semantics = [#tpu.dimension_semantics<parallel>, #tpu.dimension_semantics<arbitrary>], iteration_bounds = array<i64: 2, 2>, scalar_prefetch = 0 : i64, scratch_operands = 1 : i64, tpu.core_type = #tpu.core_type<tc>, window_params = [{transform_indices = @transform_0, window_bounds = array<i64: 8, 32>}, {transform_indices = @transform_1, window_bounds = array<i64: 1, 4, 32, 8>}, {transform_indices = @transform_2, window_bounds = array<i64: 1, 4, 32, 8>}, {transform_indices = @transform_3, window_bounds = array<i64: 1, 4, 32, 8>}, {transform_indices = @transform_4, window_bounds = array<i64: 1, 4, 1, 8>}, {transform_indices = @transform_5, window_bounds = array<i64: 1, 4, 1, 8>}, {transform_indices = @transform_6, window_bounds = array<i64: 1, 4, 1, 8>}, {transform_indices = @transform_7, window_bounds = array<i64: 1, 4, 8, 32>}, {transform_indices = @transform_8, window_bounds = array<i64: 1, 1, 32>}, {transform_indices = @transform_9, window_bounds = array<i64: 1, 1, 32>}, {transform_indices = @transform_10, window_bounds = array<i64: 1, 1, 32>}, {transform_indices = @transform_11, window_bounds = array<i64: 1, 4, 32, 8>}, {transform_indices = @transform_12, window_bounds = array<i64: 1, 4, 32, 8>}, {transform_indices = @transform_13, window_bounds = array<i64: 1, 4, 32, 8>}, {transform_indices = @transform_14, window_bounds = array<i64: 1, 4, 1, 8>}, {transform_indices = @transform_15, window_bounds = array<i64: 1, 4, 1, 8>}, {transform_indices = @transform_16, window_bounds = array<i64: 1, 4, 1, 8>}, {transform_indices = @transform_17, window_bounds = array<i64: 1, 4, 8, 32>}, {transform_indices = @transform_18, window_bounds = array<i64: 1, 1, 32>}, {transform_indices = @transform_19, window_bounds = array<i64: 1, 1, 32>}, {transform_indices = @transform_20, window_bounds = array<i64: 1, 1, 32>}, {transform_indices = @transform_21, window_bounds = array<i64: 1, 32, 64>}, {transform_indices = @transform_22, window_bounds = array<i64: 1, 1, 64>}, {transform_indices = @transform_23, window_bounds = array<i64: 1, 64, 32>}, {transform_indices = @transform_24, window_bounds = array<i64: 1, 1, 32>}, {transform_indices = @transform_25, window_bounds = array<i64: 1, 1, 32>}, {transform_indices = @transform_26, window_bounds = array<i64: 1, 1, 32>}, {pipeline_mode = #tpu.pipeline_mode<synchronous>, transform_indices = @transform_27, window_bounds = array<i64: 32, 128>}, {pipeline_mode = #tpu.pipeline_mode<synchronous>, transform_indices = @transform_28, window_bounds = array<i64: 1, 128>}, {transform_indices = @transform_29, window_bounds = array<i64: 8, 128>}]} {
    %c0_i32 = arith.constant 0 : i32
    %0 = arith.cmpi eq, %arg1, %c0_i32 : i32
    %1 = arith.extui %0 : i1 to i32
    %c0_i32_0 = arith.constant 0 : i32
    %2 = arith.cmpi ne, %1, %c0_i32_0 : i32
    scf.if %2 {
      %c0_136 = arith.constant 0 : index
      %c0_137 = arith.constant 0 : index
      %214 = vector.load %arg2[%c0_136, %c0_137] : memref<8x32xf32, #tpu.memory_space<vmem>>, vector<8x32xf32>
      %c0_138 = arith.constant 0 : index
      %c0_139 = arith.constant 0 : index
      %215 = vector.load %arg32[%c0_138, %c0_139] : memref<8x32xf32, #tpu.memory_space<vmem>>, vector<8x32xf32>
      tpu.vector_store %arg32[%c0_138, %c0_139], %214 {strides = array<i32>} : memref<8x32xf32, #tpu.memory_space<vmem>>, vector<8x32xf32>,
    } else {
    }
    %c0 = arith.constant 0 : index
    %c0_1 = arith.constant 0 : index
    %3 = vector.load %arg32[%c0, %c0_1] : memref<8x32xf32, #tpu.memory_space<vmem>>, vector<8x32xf32>
    %c0_2 = arith.constant 0 : index
    %c0_3 = arith.constant 0 : index
    %4 = vector.load %arg2[%c0_2, %c0_3] : memref<8x32xf32, #tpu.memory_space<vmem>>, vector<8x32xf32>
    %5 = arith.truncf %3 : vector<8x32xf32> to vector<8x32xbf16>
    %6 = vector.shape_cast %5 : vector<8x32xbf16> to vector<1x8x32xbf16>
    %7 = vector.shape_cast %6 : vector<1x8x32xbf16> to vector<1x8x32xbf16>
    %8 = vector.broadcast %7 : vector<1x8x32xbf16> to vector<4x8x32xbf16>
    %9 = arith.truncf %3 : vector<8x32xf32> to vector<8x32xbf16>
    %10 = vector.shape_cast %9 : vector<8x32xbf16> to vector<1x8x32xbf16>
    %11 = vector.shape_cast %10 : vector<1x8x32xbf16> to vector<1x8x32xbf16>
    %12 = vector.broadcast %11 : vector<1x8x32xbf16> to vector<4x8x32xbf16>
    %c0_4 = arith.constant 0 : index
    %c0_5 = arith.constant 0 : index
    %c0_6 = arith.constant 0 : index
    %c0_7 = arith.constant 0 : index
    %13 = vector.load %arg3[%c0_4, %c0_5, %c0_6, %c0_7] : memref<1x4x32x8xbf16, #tpu.memory_space<vmem>>, vector<1x4x32x8xbf16>
    %14 = vector.shape_cast %13 : vector<1x4x32x8xbf16> to vector<4x32x8xbf16>
    "tpu.trace_start"() <{level = 10 : i32, message = "hsd,hde->hse"}> : () -> ()
    %cst = arith.constant dense<0.000000e+00> : vector<4x8x8xf32>
    %15 = tpu.matmul %8, %14, %cst {dimension_numbers = #tpu.dot_dimension_numbers<[2], [1], [1], [2], [0, 0, 0, 1, 1, 2], [0], [0]>} : vector<4x8x32xbf16>, vector<4x32x8xbf16>, vector<4x8x8xf32> -> vector<4x8x8xf32>
    "tpu.trace_stop"() : () -> ()
    %c0_8 = arith.constant 0 : index
    %c0_9 = arith.constant 0 : index
    %c0_10 = arith.constant 0 : index
    %c0_11 = arith.constant 0 : index
    %16 = vector.load %arg6[%c0_8, %c0_9, %c0_10, %c0_11] : memref<1x4x1x8xf32, #tpu.memory_space<vmem>>, vector<1x4x1x8xf32>
    %17 = vector.shape_cast %16 : vector<1x4x1x8xf32> to vector<4x1x8xf32>
    %18 = vector.broadcast %17 : vector<4x1x8xf32> to vector<4x8x8xf32>
    %19 = arith.addf %15, %18 : vector<4x8x8xf32>
    %c0_12 = arith.constant 0 : index
    %c0_13 = arith.constant 0 : index
    %c0_14 = arith.constant 0 : index
    %c0_15 = arith.constant 0 : index
    %20 = vector.load %arg4[%c0_12, %c0_13, %c0_14, %c0_15] : memref<1x4x32x8xbf16, #tpu.memory_space<vmem>>, vector<1x4x32x8xbf16>
    %21 = vector.shape_cast %20 : vector<1x4x32x8xbf16> to vector<4x32x8xbf16>
    "tpu.trace_start"() <{level = 10 : i32, message = "hsd,hde->hse"}> : () -> ()
    %cst_16 = arith.constant dense<0.000000e+00> : vector<4x8x8xf32>
    %22 = tpu.matmul %12, %21, %cst_16 {dimension_numbers = #tpu.dot_dimension_numbers<[2], [1], [1], [2], [0, 0, 0, 1, 1, 2], [0], [0]>} : vector<4x8x32xbf16>, vector<4x32x8xbf16>, vector<4x8x8xf32> -> vector<4x8x8xf32>
    "tpu.trace_stop"() : () -> ()
    %c0_17 = arith.constant 0 : index
    %c0_18 = arith.constant 0 : index
    %c0_19 = arith.constant 0 : index
    %c0_20 = arith.constant 0 : index
    %23 = vector.load %arg7[%c0_17, %c0_18, %c0_19, %c0_20] : memref<1x4x1x8xf32, #tpu.memory_space<vmem>>, vector<1x4x1x8xf32>
    %24 = vector.shape_cast %23 : vector<1x4x1x8xf32> to vector<4x1x8xf32>
    %25 = vector.broadcast %24 : vector<4x1x8xf32> to vector<4x8x8xf32>
    %26 = arith.addf %22, %25 : vector<4x8x8xf32>
    %c0_21 = arith.constant 0 : index
    %c0_22 = arith.constant 0 : index
    %c0_23 = arith.constant 0 : index
    %c0_24 = arith.constant 0 : index
    %27 = vector.load %arg5[%c0_21, %c0_22, %c0_23, %c0_24] : memref<1x4x32x8xbf16, #tpu.memory_space<vmem>>, vector<1x4x32x8xbf16>
    %28 = vector.shape_cast %27 : vector<1x4x32x8xbf16> to vector<4x32x8xbf16>
    "tpu.trace_start"() <{level = 10 : i32, message = "hsd,hde->hse"}> : () -> ()
    %cst_25 = arith.constant dense<0.000000e+00> : vector<4x8x8xf32>
    %29 = tpu.matmul %12, %28, %cst_25 {dimension_numbers = #tpu.dot_dimension_numbers<[2], [1], [1], [2], [0, 0, 0, 1, 1, 2], [0], [0]>} : vector<4x8x32xbf16>, vector<4x32x8xbf16>, vector<4x8x8xf32> -> vector<4x8x8xf32>
    "tpu.trace_stop"() : () -> ()
    %c0_26 = arith.constant 0 : index
    %c0_27 = arith.constant 0 : index
    %c0_28 = arith.constant 0 : index
    %c0_29 = arith.constant 0 : index
    %30 = vector.load %arg8[%c0_26, %c0_27, %c0_28, %c0_29] : memref<1x4x1x8xf32, #tpu.memory_space<vmem>>, vector<1x4x1x8xf32>
    %31 = vector.shape_cast %30 : vector<1x4x1x8xf32> to vector<4x1x8xf32>
    %32 = vector.broadcast %31 : vector<4x1x8xf32> to vector<4x8x8xf32>
    %33 = arith.addf %29, %32 : vector<4x8x8xf32>
    %34 = arith.truncf %19 : vector<4x8x8xf32> to vector<4x8x8xbf16>
    %35 = arith.truncf %26 : vector<4x8x8xf32> to vector<4x8x8xbf16>
    "tpu.trace_start"() <{level = 10 : i32, message = "hqe,hke->hqk"}> : () -> ()
    %cst_30 = arith.constant dense<0.000000e+00> : vector<4x8x8xf32>
    %36 = tpu.matmul %34, %35, %cst_30 {dimension_numbers = #tpu.dot_dimension_numbers<[2], [2], [1], [1], [0, 0, 0, 1, 1, 1], [0], [0]>} : vector<4x8x8xbf16>, vector<4x8x8xbf16>, vector<4x8x8xf32> -> vector<4x8x8xf32>
    "tpu.trace_stop"() : () -> ()
    %cst_31 = arith.constant 0.353553385 : f32
    %37 = vector.broadcast %cst_31 : f32 to vector<4x8x8xf32>
    %38 = arith.mulf %36, %37 : vector<4x8x8xf32>
    %cst_32 = arith.constant dense<0xFF800000> : vector<4x8xf32>
    %39 = vector.multi_reduction <maximumf>, %38, %cst_32 [2] : vector<4x8x8xf32> to vector<4x8xf32>
    %40 = vector.shape_cast %39 : vector<4x8xf32> to vector<4x8x1xf32>
    %41 = vector.broadcast %40 : vector<4x8x1xf32> to vector<4x8x8xf32>
    %42 = arith.subf %38, %41 : vector<4x8x8xf32>
    %43 = math.exp %42 : vector<4x8x8xf32>
    %cst_33 = arith.constant dense<0.000000e+00> : vector<4x8xf32>
    %44 = vector.multi_reduction <add>, %43, %cst_33 [2] : vector<4x8x8xf32> to vector<4x8xf32>
    %45 = vector.shape_cast %44 : vector<4x8xf32> to vector<4x8x1xf32>
    %46 = tpu.reciprocal %45 {approx = true} : vector<4x8x1xf32> -> vector<4x8x1xf32>
    %47 = vector.broadcast %46 : vector<4x8x1xf32> to vector<4x8x8xf32>
    %48 = arith.mulf %43, %47 : vector<4x8x8xf32>
    %49 = arith.truncf %48 : vector<4x8x8xf32> to vector<4x8x8xbf16>
    %50 = arith.truncf %33 : vector<4x8x8xf32> to vector<4x8x8xbf16>
    "tpu.trace_start"() <{level = 10 : i32, message = "hqk,hke->hqe"}> : () -> ()
    %cst_34 = arith.constant dense<0.000000e+00> : vector<4x8x8xf32>
    %51 = tpu.matmul %49, %50, %cst_34 {dimension_numbers = #tpu.dot_dimension_numbers<[2], [1], [1], [2], [0, 0, 0, 1, 1, 2], [0], [0]>} : vector<4x8x8xbf16>, vector<4x8x8xbf16>, vector<4x8x8xf32> -> vector<4x8x8xf32>
    "tpu.trace_stop"() : () -> ()
    %52 = arith.truncf %51 : vector<4x8x8xf32> to vector<4x8x8xbf16>
    %c0_35 = arith.constant 0 : index
    %c0_36 = arith.constant 0 : index
    %c0_37 = arith.constant 0 : index
    %c0_38 = arith.constant 0 : index
    %53 = vector.load %arg9[%c0_35, %c0_36, %c0_37, %c0_38] : memref<1x4x8x32xbf16, #tpu.memory_space<vmem>>, vector<1x4x8x32xbf16>
    %54 = vector.shape_cast %53 : vector<1x4x8x32xbf16> to vector<4x8x32xbf16>
    "tpu.trace_start"() <{level = 10 : i32, message = "hqe,hed->hqd"}> : () -> ()
    %cst_39 = arith.constant dense<0.000000e+00> : vector<4x8x32xf32>
    %55 = tpu.matmul %52, %54, %cst_39 {dimension_numbers = #tpu.dot_dimension_numbers<[2], [1], [1], [2], [0, 0, 0, 1, 1, 2], [0], [0]>} : vector<4x8x8xbf16>, vector<4x8x32xbf16>, vector<4x8x32xf32> -> vector<4x8x32xf32>
    "tpu.trace_stop"() : () -> ()
    %cst_40 = arith.constant dense<0.000000e+00> : vector<8x32xf32>
    %56 = vector.multi_reduction <add>, %55, %cst_40 [0] : vector<4x8x32xf32> to vector<8x32xf32>
    %c0_41 = arith.constant 0 : index
    %c0_42 = arith.constant 0 : index
    %c0_43 = arith.constant 0 : index
    %57 = vector.load %arg10[%c0_41, %c0_42, %c0_43] : memref<1x1x32xf32, #tpu.memory_space<vmem>>, vector<1x1x32xf32>
    %58 = vector.shape_cast %57 : vector<1x1x32xf32> to vector<1x32xf32>
    %59 = vector.broadcast %58 : vector<1x32xf32> to vector<8x32xf32>
    %60 = arith.addf %56, %59 : vector<8x32xf32>
    %61 = arith.addf %3, %60 : vector<8x32xf32>
    %c0_44 = arith.constant 0 : index
    %c0_45 = arith.constant 0 : index
    %c0_46 = arith.constant 0 : index
    %62 = vector.load %arg11[%c0_44, %c0_45, %c0_46] : memref<1x1x32xf32, #tpu.memory_space<vmem>>, vector<1x1x32xf32>
    %63 = vector.shape_cast %62 : vector<1x1x32xf32> to vector<1x32xf32>
    %c0_47 = arith.constant 0 : index
    %c0_48 = arith.constant 0 : index
    %c0_49 = arith.constant 0 : index
    %64 = vector.load %arg12[%c0_47, %c0_48, %c0_49] : memref<1x1x32xf32, #tpu.memory_space<vmem>>, vector<1x1x32xf32>
    %65 = vector.shape_cast %64 : vector<1x1x32xf32> to vector<1x32xf32>
    %cst_50 = arith.constant dense<0.000000e+00> : vector<8xf32>
    %66 = vector.multi_reduction <add>, %61, %cst_50 [1] : vector<8x32xf32> to vector<8xf32>
    %67 = vector.shape_cast %66 : vector<8xf32> to vector<8x1xf32>
    %cst_51 = arith.constant 3.200000e+01 : f32
    %68 = vector.broadcast %cst_51 : f32 to vector<8x1xf32>
    %69 = arith.divf %67, %68 : vector<8x1xf32>
    %70 = vector.broadcast %69 : vector<8x1xf32> to vector<8x32xf32>
    %71 = arith.subf %61, %70 : vector<8x32xf32>
    %72 = arith.mulf %71, %71 : vector<8x32xf32>
    %cst_52 = arith.constant dense<0.000000e+00> : vector<8xf32>
    %73 = vector.multi_reduction <add>, %72, %cst_52 [1] : vector<8x32xf32> to vector<8xf32>
    %74 = vector.shape_cast %73 : vector<8xf32> to vector<8x1xf32>
    %cst_53 = arith.constant 3.200000e+01 : f32
    %75 = vector.broadcast %cst_53 : f32 to vector<8x1xf32>
    %76 = arith.divf %74, %75 : vector<8x1xf32>
    %cst_54 = arith.constant 9.99999974E-6 : f32
    %77 = vector.broadcast %cst_54 : f32 to vector<8x1xf32>
    %78 = arith.addf %76, %77 : vector<8x1xf32>
    %79 = math.rsqrt %78 : vector<8x1xf32>
    %80 = vector.broadcast %79 : vector<8x1xf32> to vector<8x32xf32>
    %81 = arith.mulf %71, %80 : vector<8x32xf32>
    %82 = vector.broadcast %63 : vector<1x32xf32> to vector<8x32xf32>
    %83 = arith.mulf %81, %82 : vector<8x32xf32>
    %84 = vector.broadcast %65 : vector<1x32xf32> to vector<8x32xf32>
    %85 = arith.addf %83, %84 : vector<8x32xf32>
    %86 = arith.truncf %85 : vector<8x32xf32> to vector<8x32xbf16>
    %87 = vector.shape_cast %86 : vector<8x32xbf16> to vector<1x8x32xbf16>
    %88 = vector.shape_cast %87 : vector<1x8x32xbf16> to vector<1x8x32xbf16>
    %89 = vector.broadcast %88 : vector<1x8x32xbf16> to vector<4x8x32xbf16>
    %90 = arith.truncf %4 : vector<8x32xf32> to vector<8x32xbf16>
    %91 = vector.shape_cast %90 : vector<8x32xbf16> to vector<1x8x32xbf16>
    %92 = vector.shape_cast %91 : vector<1x8x32xbf16> to vector<1x8x32xbf16>
    %93 = vector.broadcast %92 : vector<1x8x32xbf16> to vector<4x8x32xbf16>
    %c0_55 = arith.constant 0 : index
    %c0_56 = arith.constant 0 : index
    %c0_57 = arith.constant 0 : index
    %c0_58 = arith.constant 0 : index
    %94 = vector.load %arg13[%c0_55, %c0_56, %c0_57, %c0_58] : memref<1x4x32x8xbf16, #tpu.memory_space<vmem>>, vector<1x4x32x8xbf16>
    %95 = vector.shape_cast %94 : vector<1x4x32x8xbf16> to vector<4x32x8xbf16>
    "tpu.trace_start"() <{level = 10 : i32, message = "hsd,hde->hse"}> : () -> ()
    %cst_59 = arith.constant dense<0.000000e+00> : vector<4x8x8xf32>
    %96 = tpu.matmul %89, %95, %cst_59 {dimension_numbers = #tpu.dot_dimension_numbers<[2], [1], [1], [2], [0, 0, 0, 1, 1, 2], [0], [0]>} : vector<4x8x32xbf16>, vector<4x32x8xbf16>, vector<4x8x8xf32> -> vector<4x8x8xf32>
    "tpu.trace_stop"() : () -> ()
    %c0_60 = arith.constant 0 : index
    %c0_61 = arith.constant 0 : index
    %c0_62 = arith.constant 0 : index
    %c0_63 = arith.constant 0 : index
    %97 = vector.load %arg16[%c0_60, %c0_61, %c0_62, %c0_63] : memref<1x4x1x8xf32, #tpu.memory_space<vmem>>, vector<1x4x1x8xf32>
    %98 = vector.shape_cast %97 : vector<1x4x1x8xf32> to vector<4x1x8xf32>
    %99 = vector.broadcast %98 : vector<4x1x8xf32> to vector<4x8x8xf32>
    %100 = arith.addf %96, %99 : vector<4x8x8xf32>
    %c0_64 = arith.constant 0 : index
    %c0_65 = arith.constant 0 : index
    %c0_66 = arith.constant 0 : index
    %c0_67 = arith.constant 0 : index
    %101 = vector.load %arg14[%c0_64, %c0_65, %c0_66, %c0_67] : memref<1x4x32x8xbf16, #tpu.memory_space<vmem>>, vector<1x4x32x8xbf16>
    %102 = vector.shape_cast %101 : vector<1x4x32x8xbf16> to vector<4x32x8xbf16>
    "tpu.trace_start"() <{level = 10 : i32, message = "hsd,hde->hse"}> : () -> ()
    %cst_68 = arith.constant dense<0.000000e+00> : vector<4x8x8xf32>
    %103 = tpu.matmul %93, %102, %cst_68 {dimension_numbers = #tpu.dot_dimension_numbers<[2], [1], [1], [2], [0, 0, 0, 1, 1, 2], [0], [0]>} : vector<4x8x32xbf16>, vector<4x32x8xbf16>, vector<4x8x8xf32> -> vector<4x8x8xf32>
    "tpu.trace_stop"() : () -> ()
    %c0_69 = arith.constant 0 : index
    %c0_70 = arith.constant 0 : index
    %c0_71 = arith.constant 0 : index
    %c0_72 = arith.constant 0 : index
    %104 = vector.load %arg17[%c0_69, %c0_70, %c0_71, %c0_72] : memref<1x4x1x8xf32, #tpu.memory_space<vmem>>, vector<1x4x1x8xf32>
    %105 = vector.shape_cast %104 : vector<1x4x1x8xf32> to vector<4x1x8xf32>
    %106 = vector.broadcast %105 : vector<4x1x8xf32> to vector<4x8x8xf32>
    %107 = arith.addf %103, %106 : vector<4x8x8xf32>
    %c0_73 = arith.constant 0 : index
    %c0_74 = arith.constant 0 : index
    %c0_75 = arith.constant 0 : index
    %c0_76 = arith.constant 0 : index
    %108 = vector.load %arg15[%c0_73, %c0_74, %c0_75, %c0_76] : memref<1x4x32x8xbf16, #tpu.memory_space<vmem>>, vector<1x4x32x8xbf16>
    %109 = vector.shape_cast %108 : vector<1x4x32x8xbf16> to vector<4x32x8xbf16>
    "tpu.trace_start"() <{level = 10 : i32, message = "hsd,hde->hse"}> : () -> ()
    %cst_77 = arith.constant dense<0.000000e+00> : vector<4x8x8xf32>
    %110 = tpu.matmul %93, %109, %cst_77 {dimension_numbers = #tpu.dot_dimension_numbers<[2], [1], [1], [2], [0, 0, 0, 1, 1, 2], [0], [0]>} : vector<4x8x32xbf16>, vector<4x32x8xbf16>, vector<4x8x8xf32> -> vector<4x8x8xf32>
    "tpu.trace_stop"() : () -> ()
    %c0_78 = arith.constant 0 : index
    %c0_79 = arith.constant 0 : index
    %c0_80 = arith.constant 0 : index
    %c0_81 = arith.constant 0 : index
    %111 = vector.load %arg18[%c0_78, %c0_79, %c0_80, %c0_81] : memref<1x4x1x8xf32, #tpu.memory_space<vmem>>, vector<1x4x1x8xf32>
    %112 = vector.shape_cast %111 : vector<1x4x1x8xf32> to vector<4x1x8xf32>
    %113 = vector.broadcast %112 : vector<4x1x8xf32> to vector<4x8x8xf32>
    %114 = arith.addf %110, %113 : vector<4x8x8xf32>
    %115 = arith.truncf %100 : vector<4x8x8xf32> to vector<4x8x8xbf16>
    %116 = arith.truncf %107 : vector<4x8x8xf32> to vector<4x8x8xbf16>
    "tpu.trace_start"() <{level = 10 : i32, message = "hqe,hke->hqk"}> : () -> ()
    %cst_82 = arith.constant dense<0.000000e+00> : vector<4x8x8xf32>
    %117 = tpu.matmul %115, %116, %cst_82 {dimension_numbers = #tpu.dot_dimension_numbers<[2], [2], [1], [1], [0, 0, 0, 1, 1, 1], [0], [0]>} : vector<4x8x8xbf16>, vector<4x8x8xbf16>, vector<4x8x8xf32> -> vector<4x8x8xf32>
    "tpu.trace_stop"() : () -> ()
    %cst_83 = arith.constant 0.353553385 : f32
    %118 = vector.broadcast %cst_83 : f32 to vector<4x8x8xf32>
    %119 = arith.mulf %117, %118 : vector<4x8x8xf32>
    %cst_84 = arith.constant dense<0xFF800000> : vector<4x8xf32>
    %120 = vector.multi_reduction <maximumf>, %119, %cst_84 [2] : vector<4x8x8xf32> to vector<4x8xf32>
    %121 = vector.shape_cast %120 : vector<4x8xf32> to vector<4x8x1xf32>
    %122 = vector.broadcast %121 : vector<4x8x1xf32> to vector<4x8x8xf32>
    %123 = arith.subf %119, %122 : vector<4x8x8xf32>
    %124 = math.exp %123 : vector<4x8x8xf32>
    %cst_85 = arith.constant dense<0.000000e+00> : vector<4x8xf32>
    %125 = vector.multi_reduction <add>, %124, %cst_85 [2] : vector<4x8x8xf32> to vector<4x8xf32>
    %126 = vector.shape_cast %125 : vector<4x8xf32> to vector<4x8x1xf32>
    %127 = tpu.reciprocal %126 {approx = true} : vector<4x8x1xf32> -> vector<4x8x1xf32>
    %128 = vector.broadcast %127 : vector<4x8x1xf32> to vector<4x8x8xf32>
    %129 = arith.mulf %124, %128 : vector<4x8x8xf32>
    %130 = arith.truncf %129 : vector<4x8x8xf32> to vector<4x8x8xbf16>
    %131 = arith.truncf %114 : vector<4x8x8xf32> to vector<4x8x8xbf16>
    "tpu.trace_start"() <{level = 10 : i32, message = "hqk,hke->hqe"}> : () -> ()
    %cst_86 = arith.constant dense<0.000000e+00> : vector<4x8x8xf32>
    %132 = tpu.matmul %130, %131, %cst_86 {dimension_numbers = #tpu.dot_dimension_numbers<[2], [1], [1], [2], [0, 0, 0, 1, 1, 2], [0], [0]>} : vector<4x8x8xbf16>, vector<4x8x8xbf16>, vector<4x8x8xf32> -> vector<4x8x8xf32>
    "tpu.trace_stop"() : () -> ()
    %133 = arith.truncf %132 : vector<4x8x8xf32> to vector<4x8x8xbf16>
    %c0_87 = arith.constant 0 : index
    %c0_88 = arith.constant 0 : index
    %c0_89 = arith.constant 0 : index
    %c0_90 = arith.constant 0 : index
    %134 = vector.load %arg19[%c0_87, %c0_88, %c0_89, %c0_90] : memref<1x4x8x32xbf16, #tpu.memory_space<vmem>>, vector<1x4x8x32xbf16>
    %135 = vector.shape_cast %134 : vector<1x4x8x32xbf16> to vector<4x8x32xbf16>
    "tpu.trace_start"() <{level = 10 : i32, message = "hqe,hed->hqd"}> : () -> ()
    %cst_91 = arith.constant dense<0.000000e+00> : vector<4x8x32xf32>
    %136 = tpu.matmul %133, %135, %cst_91 {dimension_numbers = #tpu.dot_dimension_numbers<[2], [1], [1], [2], [0, 0, 0, 1, 1, 2], [0], [0]>} : vector<4x8x8xbf16>, vector<4x8x32xbf16>, vector<4x8x32xf32> -> vector<4x8x32xf32>
    "tpu.trace_stop"() : () -> ()
    %cst_92 = arith.constant dense<0.000000e+00> : vector<8x32xf32>
    %137 = vector.multi_reduction <add>, %136, %cst_92 [0] : vector<4x8x32xf32> to vector<8x32xf32>
    %c0_93 = arith.constant 0 : index
    %c0_94 = arith.constant 0 : index
    %c0_95 = arith.constant 0 : index
    %138 = vector.load %arg20[%c0_93, %c0_94, %c0_95] : memref<1x1x32xf32, #tpu.memory_space<vmem>>, vector<1x1x32xf32>
    %139 = vector.shape_cast %138 : vector<1x1x32xf32> to vector<1x32xf32>
    %140 = vector.broadcast %139 : vector<1x32xf32> to vector<8x32xf32>
    %141 = arith.addf %137, %140 : vector<8x32xf32>
    %142 = arith.addf %85, %141 : vector<8x32xf32>
    %c0_96 = arith.constant 0 : index
    %c0_97 = arith.constant 0 : index
    %c0_98 = arith.constant 0 : index
    %143 = vector.load %arg21[%c0_96, %c0_97, %c0_98] : memref<1x1x32xf32, #tpu.memory_space<vmem>>, vector<1x1x32xf32>
    %144 = vector.shape_cast %143 : vector<1x1x32xf32> to vector<1x32xf32>
    %c0_99 = arith.constant 0 : index
    %c0_100 = arith.constant 0 : index
    %c0_101 = arith.constant 0 : index
    %145 = vector.load %arg22[%c0_99, %c0_100, %c0_101] : memref<1x1x32xf32, #tpu.memory_space<vmem>>, vector<1x1x32xf32>
    %146 = vector.shape_cast %145 : vector<1x1x32xf32> to vector<1x32xf32>
    %cst_102 = arith.constant dense<0.000000e+00> : vector<8xf32>
    %147 = vector.multi_reduction <add>, %142, %cst_102 [1] : vector<8x32xf32> to vector<8xf32>
    %148 = vector.shape_cast %147 : vector<8xf32> to vector<8x1xf32>
    %cst_103 = arith.constant 3.200000e+01 : f32
    %149 = vector.broadcast %cst_103 : f32 to vector<8x1xf32>
    %150 = arith.divf %148, %149 : vector<8x1xf32>
    %151 = vector.broadcast %150 : vector<8x1xf32> to vector<8x32xf32>
    %152 = arith.subf %142, %151 : vector<8x32xf32>
    %153 = arith.mulf %152, %152 : vector<8x32xf32>
    %cst_104 = arith.constant dense<0.000000e+00> : vector<8xf32>
    %154 = vector.multi_reduction <add>, %153, %cst_104 [1] : vector<8x32xf32> to vector<8xf32>
    %155 = vector.shape_cast %154 : vector<8xf32> to vector<8x1xf32>
    %cst_105 = arith.constant 3.200000e+01 : f32
    %156 = vector.broadcast %cst_105 : f32 to vector<8x1xf32>
    %157 = arith.divf %155, %156 : vector<8x1xf32>
    %cst_106 = arith.constant 9.99999974E-6 : f32
    %158 = vector.broadcast %cst_106 : f32 to vector<8x1xf32>
    %159 = arith.addf %157, %158 : vector<8x1xf32>
    %160 = math.rsqrt %159 : vector<8x1xf32>
    %161 = vector.broadcast %160 : vector<8x1xf32> to vector<8x32xf32>
    %162 = arith.mulf %152, %161 : vector<8x32xf32>
    %163 = vector.broadcast %144 : vector<1x32xf32> to vector<8x32xf32>
    %164 = arith.mulf %162, %163 : vector<8x32xf32>
    %165 = vector.broadcast %146 : vector<1x32xf32> to vector<8x32xf32>
    %166 = arith.addf %164, %165 : vector<8x32xf32>
    %167 = arith.truncf %166 : vector<8x32xf32> to vector<8x32xbf16>
    %c0_107 = arith.constant 0 : index
    %c0_108 = arith.constant 0 : index
    %c0_109 = arith.constant 0 : index
    %168 = vector.load %arg23[%c0_107, %c0_108, %c0_109] : memref<1x32x64xbf16, #tpu.memory_space<vmem>>, vector<1x32x64xbf16>
    %169 = vector.shape_cast %168 : vector<1x32x64xbf16> to vector<32x64xbf16>
    %cst_110 = arith.constant dense<0.000000e+00> : vector<8x64xf32>
    %170 = tpu.matmul %167, %169, %cst_110 {dimension_numbers = #tpu.dot_dimension_numbers<[1], [0], [0], [1], [0, 0, 1, 1], [], []>} : vector<8x32xbf16>, vector<32x64xbf16>, vector<8x64xf32> -> vector<8x64xf32>
    %c0_111 = arith.constant 0 : index
    %c0_112 = arith.constant 0 : index
    %c0_113 = arith.constant 0 : index
    %171 = vector.load %arg24[%c0_111, %c0_112, %c0_113] : memref<1x1x64xf32, #tpu.memory_space<vmem>>, vector<1x1x64xf32>
    %172 = vector.shape_cast %171 : vector<1x1x64xf32> to vector<1x64xf32>
    %173 = vector.broadcast %172 : vector<1x64xf32> to vector<8x64xf32>
    %174 = arith.addf %170, %173 : vector<8x64xf32>
    %cst_114 = arith.constant 0.000000e+00 : f32
    %175 = vector.broadcast %cst_114 : f32 to vector<8x64xf32>
    %176 = arith.maximumf %174, %175 : vector<8x64xf32>
    %177 = arith.truncf %176 : vector<8x64xf32> to vector<8x64xbf16>
    %c0_115 = arith.constant 0 : index
    %c0_116 = arith.constant 0 : index
    %c0_117 = arith.constant 0 : index
    %178 = vector.load %arg25[%c0_115, %c0_116, %c0_117] : memref<1x64x32xbf16, #tpu.memory_space<vmem>>, vector<1x64x32xbf16>
    %179 = vector.shape_cast %178 : vector<1x64x32xbf16> to vector<64x32xbf16>
    %cst_118 = arith.constant dense<0.000000e+00> : vector<8x32xf32>
    %180 = tpu.matmul %177, %179, %cst_118 {dimension_numbers = #tpu.dot_dimension_numbers<[1], [0], [0], [1], [0, 0, 1, 1], [], []>} : vector<8x64xbf16>, vector<64x32xbf16>, vector<8x32xf32> -> vector<8x32xf32>
    %c0_119 = arith.constant 0 : index
    %c0_120 = arith.constant 0 : index
    %c0_121 = arith.constant 0 : index
    %181 = vector.load %arg26[%c0_119, %c0_120, %c0_121] : memref<1x1x32xf32, #tpu.memory_space<vmem>>, vector<1x1x32xf32>
    %182 = vector.shape_cast %181 : vector<1x1x32xf32> to vector<1x32xf32>
    %183 = vector.broadcast %182 : vector<1x32xf32> to vector<8x32xf32>
    %184 = arith.addf %180, %183 : vector<8x32xf32>
    %185 = arith.addf %166, %184 : vector<8x32xf32>
    %c0_122 = arith.constant 0 : index
    %c0_123 = arith.constant 0 : index
    %c0_124 = arith.constant 0 : index
    %186 = vector.load %arg27[%c0_122, %c0_123, %c0_124] : memref<1x1x32xf32, #tpu.memory_space<vmem>>, vector<1x1x32xf32>
    %187 = vector.shape_cast %186 : vector<1x1x32xf32> to vector<1x32xf32>
    %c0_125 = arith.constant 0 : index
    %c0_126 = arith.constant 0 : index
    %c0_127 = arith.constant 0 : index
    %188 = vector.load %arg28[%c0_125, %c0_126, %c0_127] : memref<1x1x32xf32, #tpu.memory_space<vmem>>, vector<1x1x32xf32>
    %189 = vector.shape_cast %188 : vector<1x1x32xf32> to vector<1x32xf32>
    %cst_128 = arith.constant dense<0.000000e+00> : vector<8xf32>
    %190 = vector.multi_reduction <add>, %185, %cst_128 [1] : vector<8x32xf32> to vector<8xf32>
    %191 = vector.shape_cast %190 : vector<8xf32> to vector<8x1xf32>
    %cst_129 = arith.constant 3.200000e+01 : f32
    %192 = vector.broadcast %cst_129 : f32 to vector<8x1xf32>
    %193 = arith.divf %191, %192 : vector<8x1xf32>
    %194 = vector.broadcast %193 : vector<8x1xf32> to vector<8x32xf32>
    %195 = arith.subf %185, %194 : vector<8x32xf32>
    %196 = arith.mulf %195, %195 : vector<8x32xf32>
    %cst_130 = arith.constant dense<0.000000e+00> : vector<8xf32>
    %197 = vector.multi_reduction <add>, %196, %cst_130 [1] : vector<8x32xf32> to vector<8xf32>
    %198 = vector.shape_cast %197 : vector<8xf32> to vector<8x1xf32>
    %cst_131 = arith.constant 3.200000e+01 : f32
    %199 = vector.broadcast %cst_131 : f32 to vector<8x1xf32>
    %200 = arith.divf %198, %199 : vector<8x1xf32>
    %cst_132 = arith.constant 9.99999974E-6 : f32
    %201 = vector.broadcast %cst_132 : f32 to vector<8x1xf32>
    %202 = arith.addf %200, %201 : vector<8x1xf32>
    %203 = math.rsqrt %202 : vector<8x1xf32>
    %204 = vector.broadcast %203 : vector<8x1xf32> to vector<8x32xf32>
    %205 = arith.mulf %195, %204 : vector<8x32xf32>
    %206 = vector.broadcast %187 : vector<1x32xf32> to vector<8x32xf32>
    %207 = arith.mulf %205, %206 : vector<8x32xf32>
    %208 = vector.broadcast %189 : vector<1x32xf32> to vector<8x32xf32>
    %209 = arith.addf %207, %208 : vector<8x32xf32>
    %c0_133 = arith.constant 0 : index
    %c0_134 = arith.constant 0 : index
    %210 = vector.load %arg32[%c0_133, %c0_134] : memref<8x32xf32, #tpu.memory_space<vmem>>, vector<8x32xf32>
    tpu.vector_store %arg32[%c0_133, %c0_134], %209 {strides = array<i32>} : memref<8x32xf32, #tpu.memory_space<vmem>>, vector<8x32xf32>,
    %c1_i32 = arith.constant 1 : i32
    %211 = arith.cmpi eq, %arg1, %c1_i32 : i32
    %212 = arith.extui %211 : i1 to i32
    %c0_i32_135 = arith.constant 0 : i32
    %213 = arith.cmpi ne, %212, %c0_i32_135 : i32
    scf.if %213 {
      %214 = arith.truncf %209 : vector<8x32xf32> to vector<8x32xbf16>
      %c0_136 = arith.constant 0 : index
      %c0_137 = arith.constant 0 : index
      %215 = vector.load %arg29[%c0_136, %c0_137] : memref<32x128xbf16, #tpu.memory_space<vmem>>, vector<32x128xbf16>
      %cst_138 = arith.constant dense<0.000000e+00> : vector<8x128xf32>
      %216 = tpu.matmul %214, %215, %cst_138 {dimension_numbers = #tpu.dot_dimension_numbers<[1], [0], [0], [1], [0, 0, 1, 1], [], []>} : vector<8x32xbf16>, vector<32x128xbf16>, vector<8x128xf32> -> vector<8x128xf32>
      %c0_139 = arith.constant 0 : index
      %c0_140 = arith.constant 0 : index
      %217 = vector.load %arg30[%c0_139, %c0_140] : memref<1x128xf32, #tpu.memory_space<vmem>>, vector<1x128xf32>
      %218 = vector.broadcast %217 : vector<1x128xf32> to vector<8x128xf32>
      %219 = arith.addf %216, %218 : vector<8x128xf32>
      %c0_141 = arith.constant 0 : index
      %c0_142 = arith.constant 0 : index
      %220 = vector.load %arg31[%c0_141, %c0_142] : memref<8x128xf32, #tpu.memory_space<vmem>>, vector<8x128xf32>
      tpu.vector_store %arg31[%c0_141, %c0_142], %219 {strides = array<i32>} : memref<8x128xf32, #tpu.memory_space<vmem>>, vector<8x128xf32>,
    } else {
    }
    return
  }
  func.func @transform_0(%arg0: i32, %arg1: i32) -> (i32, i32) {
    %c0_i32 = arith.constant 0 : i32
    %c0_i32_0 = arith.constant 0 : i32
    return %arg0, %c0_i32 : i32, i32
  }
  func.func @transform_1(%arg0: i32, %arg1: i32) -> (i32, i32, i32, i32) {
    %c0_i32 = arith.constant 0 : i32
    %c0_i32_0 = arith.constant 0 : i32
    %c0_i32_1 = arith.constant 0 : i32
    %c0_i32_2 = arith.constant 0 : i32
    return %arg1, %c0_i32, %c0_i32_0, %c0_i32_1 : i32, i32, i32, i32
  }
  func.func @transform_2(%arg0: i32, %arg1: i32) -> (i32, i32, i32, i32) {
    %c0_i32 = arith.constant 0 : i32
    %c0_i32_0 = arith.constant 0 : i32
    %c0_i32_1 = arith.constant 0 : i32
    %c0_i32_2 = arith.constant 0 : i32
    return %arg1, %c0_i32, %c0_i32_0, %c0_i32_1 : i32, i32, i32, i32
  }
  func.func @transform_3(%arg0: i32, %arg1: i32) -> (i32, i32, i32, i32) {
    %c0_i32 = arith.constant 0 : i32
    %c0_i32_0 = arith.constant 0 : i32
    %c0_i32_1 = arith.constant 0 : i32
    %c0_i32_2 = arith.constant 0 : i32
    return %arg1, %c0_i32, %c0_i32_0, %c0_i32_1 : i32, i32, i32, i32
  }
  func.func @transform_4(%arg0: i32, %arg1: i32) -> (i32, i32, i32, i32) {
    %c0_i32 = arith.constant 0 : i32
    %c0_i32_0 = arith.constant 0 : i32
    %c0_i32_1 = arith.constant 0 : i32
    %c0_i32_2 = arith.constant 0 : i32
    return %arg1, %c0_i32, %c0_i32_0, %c0_i32_1 : i32, i32, i32, i32
  }
  func.func @transform_5(%arg0: i32, %arg1: i32) -> (i32, i32, i32, i32) {
    %c0_i32 = arith.constant 0 : i32
    %c0_i32_0 = arith.constant 0 : i32
    %c0_i32_1 = arith.constant 0 : i32
    %c0_i32_2 = arith.constant 0 : i32
    return %arg1, %c0_i32, %c0_i32_0, %c0_i32_1 : i32, i32, i32, i32
  }
  func.func @transform_6(%arg0: i32, %arg1: i32) -> (i32, i32, i32, i32) {
    %c0_i32 = arith.constant 0 : i32
    %c0_i32_0 = arith.constant 0 : i32
    %c0_i32_1 = arith.constant 0 : i32
    %c0_i32_2 = arith.constant 0 : i32
    return %arg1, %c0_i32, %c0_i32_0, %c0_i32_1 : i32, i32, i32, i32
  }
  func.func @transform_7(%arg0: i32, %arg1: i32) -> (i32, i32, i32, i32) {
    %c0_i32 = arith.constant 0 : i32
    %c0_i32_0 = arith.constant 0 : i32
    %c0_i32_1 = arith.constant 0 : i32
    %c0_i32_2 = arith.constant 0 : i32
    return %arg1, %c0_i32, %c0_i32_0, %c0_i32_1 : i32, i32, i32, i32
  }
  func.func @transform_8(%arg0: i32, %arg1: i32) -> (i32, i32, i32) {
    %c0_i32 = arith.constant 0 : i32
    %c0_i32_0 = arith.constant 0 : i32
    %c0_i32_1 = arith.constant 0 : i32
    return %arg1, %c0_i32, %c0_i32_0 : i32, i32, i32
  }
  func.func @transform_9(%arg0: i32, %arg1: i32) -> (i32, i32, i32) {
    %c0_i32 = arith.constant 0 : i32
    %c0_i32_0 = arith.constant 0 : i32
    %c0_i32_1 = arith.constant 0 : i32
    return %arg1, %c0_i32, %c0_i32_0 : i32, i32, i32
  }
  func.func @transform_10(%arg0: i32, %arg1: i32) -> (i32, i32, i32) {
    %c0_i32 = arith.constant 0 : i32
    %c0_i32_0 = arith.constant 0 : i32
    %c0_i32_1 = arith.constant 0 : i32
    return %arg1, %c0_i32, %c0_i32_0 : i32, i32, i32
  }
  func.func @transform_11(%arg0: i32, %arg1: i32) -> (i32, i32, i32, i32) {
    %c0_i32 = arith.constant 0 : i32
    %c0_i32_0 = arith.constant 0 : i32
    %c0_i32_1 = arith.constant 0 : i32
    %c0_i32_2 = arith.constant 0 : i32
    return %arg1, %c0_i32, %c0_i32_0, %c0_i32_1 : i32, i32, i32, i32
  }
  func.func @transform_12(%arg0: i32, %arg1: i32) -> (i32, i32, i32, i32) {
    %c0_i32 = arith.constant 0 : i32
    %c0_i32_0 = arith.constant 0 : i32
    %c0_i32_1 = arith.constant 0 : i32
    %c0_i32_2 = arith.constant 0 : i32
    return %arg1, %c0_i32, %c0_i32_0, %c0_i32_1 : i32, i32, i32, i32
  }
  func.func @transform_13(%arg0: i32, %arg1: i32) -> (i32, i32, i32, i32) {
    %c0_i32 = arith.constant 0 : i32
    %c0_i32_0 = arith.constant 0 : i32
    %c0_i32_1 = arith.constant 0 : i32
    %c0_i32_2 = arith.constant 0 : i32
    return %arg1, %c0_i32, %c0_i32_0, %c0_i32_1 : i32, i32, i32, i32
  }
  func.func @transform_14(%arg0: i32, %arg1: i32) -> (i32, i32, i32, i32) {
    %c0_i32 = arith.constant 0 : i32
    %c0_i32_0 = arith.constant 0 : i32
    %c0_i32_1 = arith.constant 0 : i32
    %c0_i32_2 = arith.constant 0 : i32
    return %arg1, %c0_i32, %c0_i32_0, %c0_i32_1 : i32, i32, i32, i32
  }
  func.func @transform_15(%arg0: i32, %arg1: i32) -> (i32, i32, i32, i32) {
    %c0_i32 = arith.constant 0 : i32
    %c0_i32_0 = arith.constant 0 : i32
    %c0_i32_1 = arith.constant 0 : i32
    %c0_i32_2 = arith.constant 0 : i32
    return %arg1, %c0_i32, %c0_i32_0, %c0_i32_1 : i32, i32, i32, i32
  }
  func.func @transform_16(%arg0: i32, %arg1: i32) -> (i32, i32, i32, i32) {
    %c0_i32 = arith.constant 0 : i32
    %c0_i32_0 = arith.constant 0 : i32
    %c0_i32_1 = arith.constant 0 : i32
    %c0_i32_2 = arith.constant 0 : i32
    return %arg1, %c0_i32, %c0_i32_0, %c0_i32_1 : i32, i32, i32, i32
  }
  func.func @transform_17(%arg0: i32, %arg1: i32) -> (i32, i32, i32, i32) {
    %c0_i32 = arith.constant 0 : i32
    %c0_i32_0 = arith.constant 0 : i32
    %c0_i32_1 = arith.constant 0 : i32
    %c0_i32_2 = arith.constant 0 : i32
    return %arg1, %c0_i32, %c0_i32_0, %c0_i32_1 : i32, i32, i32, i32
  }
  func.func @transform_18(%arg0: i32, %arg1: i32) -> (i32, i32, i32) {
    %c0_i32 = arith.constant 0 : i32
    %c0_i32_0 = arith.constant 0 : i32
    %c0_i32_1 = arith.constant 0 : i32
    return %arg1, %c0_i32, %c0_i32_0 : i32, i32, i32
  }
  func.func @transform_19(%arg0: i32, %arg1: i32) -> (i32, i32, i32) {
    %c0_i32 = arith.constant 0 : i32
    %c0_i32_0 = arith.constant 0 : i32
    %c0_i32_1 = arith.constant 0 : i32
    return %arg1, %c0_i32, %c0_i32_0 : i32, i32, i32
  }
  func.func @transform_20(%arg0: i32, %arg1: i32) -> (i32, i32, i32) {
    %c0_i32 = arith.constant 0 : i32
    %c0_i32_0 = arith.constant 0 : i32
    %c0_i32_1 = arith.constant 0 : i32
    return %arg1, %c0_i32, %c0_i32_0 : i32, i32, i32
  }
  func.func @transform_21(%arg0: i32, %arg1: i32) -> (i32, i32, i32) {
    %c0_i32 = arith.constant 0 : i32
    %c0_i32_0 = arith.constant 0 : i32
    %c0_i32_1 = arith.constant 0 : i32
    return %arg1, %c0_i32, %c0_i32_0 : i32, i32, i32
  }
  func.func @transform_22(%arg0: i32, %arg1: i32) -> (i32, i32, i32) {
    %c0_i32 = arith.constant 0 : i32
    %c0_i32_0 = arith.constant 0 : i32
    %c0_i32_1 = arith.constant 0 : i32
    return %arg1, %c0_i32, %c0_i32_0 : i32, i32, i32
  }
  func.func @transform_23(%arg0: i32, %arg1: i32) -> (i32, i32, i32) {
    %c0_i32 = arith.constant 0 : i32
    %c0_i32_0 = arith.constant 0 : i32
    %c0_i32_1 = arith.constant 0 : i32
    return %arg1, %c0_i32, %c0_i32_0 : i32, i32, i32
  }
  func.func @transform_24(%arg0: i32, %arg1: i32) -> (i32, i32, i32) {
    %c0_i32 = arith.constant 0 : i32
    %c0_i32_0 = arith.constant 0 : i32
    %c0_i32_1 = arith.constant 0 : i32
    return %arg1, %c0_i32, %c0_i32_0 : i32, i32, i32
  }
  func.func @transform_25(%arg0: i32, %arg1: i32) -> (i32, i32, i32) {
    %c0_i32 = arith.constant 0 : i32
    %c0_i32_0 = arith.constant 0 : i32
    %c0_i32_1 = arith.constant 0 : i32
    return %arg1, %c0_i32, %c0_i32_0 : i32, i32, i32
  }
  func.func @transform_26(%arg0: i32, %arg1: i32) -> (i32, i32, i32) {
    %c0_i32 = arith.constant 0 : i32
    %c0_i32_0 = arith.constant 0 : i32
    %c0_i32_1 = arith.constant 0 : i32
    return %arg1, %c0_i32, %c0_i32_0 : i32, i32, i32
  }
  func.func @transform_27(%arg0: i32, %arg1: i32) -> (i32, i32) {
    %c0_i32 = arith.constant 0 : i32
    %c0_i32_0 = arith.constant 0 : i32
    %c0_i32_1 = arith.constant 0 : i32
    return %c0_i32, %c0_i32_0 : i32, i32
  }
  func.func @transform_28(%arg0: i32, %arg1: i32) -> (i32, i32) {
    %c0_i32 = arith.constant 0 : i32
    %c0_i32_0 = arith.constant 0 : i32
    %c0_i32_1 = arith.constant 0 : i32
    return %c0_i32, %c0_i32_0 : i32, i32
  }
  func.func @transform_29(%arg0: i32, %arg1: i32) -> (i32, i32) {
    %c0_i32 = arith.constant 0 : i32
    %c0_i32_0 = arith.constant 0 : i32
    return %arg0, %c0_i32 : i32, i32
  }
}

</mosaic_0001>

<bundles_post_ra>
// kernel: floorplan_transformer_forward.1
= control target key start
LH: loop header
LB: loop body
LE: loop exit
PB: predicated region body
PF: predicated region fallthrough
CT: control target
= control target key end

     0   :  { %s5749_s6 = smov 1   ;;  %s5750_s10 = smov 2   ;;  %s6516_s0 = inlined_call_operand.smem [shape: u32[30], index: -1, kind: input, shape index: {}] }
   0x1   :  { %s5790_s5 = sld [smem:[%s6516_s0]]   ;;  %s5751_s14 = smov 3  }
   0x2   :  { %s5795_s9 = sld [smem:[%s6516_s0 + %s5749_s6]]   ;;  %s5752_s18 = smov 4  }
   0x3   :  { %s5800_s13 = sld [smem:[%s6516_s0 + %s5750_s10]]   ;;  %s5753_s22 = smov 5  }
   0x4   :  { %s5805_s17 = sld [smem:[%s6516_s0 + %s5751_s14]]   ;;  %s5754_s26 = smov 6  }
   0x5   :  { %s5810_s21 = sld [smem:[%s6516_s0 + %s5752_s18]]   ;;  %s5755_s30 = smov 7  }
   0x6   :  { %s5815_s25 = sld [smem:[%s6516_s0 + %s5753_s22]]   ;;  %s5756_s4 = smov 8  }
   0x7   :  { %6536 = sst [smem:[#allocation3_spill]] %s5790_s5  ;;  %s5757_s10 = smov 9  }
   0x8   :  { %6537 = sst [smem:[#allocation4_spill]] %s5795_s9  ;;  %s5758_s15 = smov 10  }
   0x9   :  { %6538 = sst [smem:[#allocation5_spill]] %s5800_s13  ;;  %s5759_s20 = smov 11  }
   0xa   :  { %6539 = sst [smem:[#allocation6_spill]] %s5805_s17  ;;  %s5761_s1 = smov 13  }
   0xb   :  { %6540 = sst [smem:[#allocation7_spill]] %s5810_s21  ;;  %s5762_s7 = smov 14  }
   0xc   :  { %6541 = sst [smem:[#allocation8_spill]] %s5815_s25  ;;  %s5764_s22 = smov 16  }
   0xd   :  { %s5820_s29 = sld [smem:[%s6516_s0 + %s5754_s26]]   ;;  %s5760_s26 = smov 12  }
   0xe   :  { %s5825_s3 = sld [smem:[%s6516_s0 + %s5755_s30]]   ;;  %s5765_s28 = smov 17  }
   0xf   :  { %s5830_s8 = sld [smem:[%s6516_s0 + %s5756_s4]]   ;;  %s5941_s11 = smov 0  }
  0x10   :  { %s5835_s14 = sld [smem:[%s6516_s0 + %s5757_s10]]   ;;  %s5939_s10 = smov 0  }
  0x11   :  { %s5840_s19 = sld [smem:[%s6516_s0 + %s5758_s15]]   ;;  %s5763_s15 = smov 15  }
  0x12   :  { %s5845_s24 = sld [smem:[%s6516_s0 + %s5759_s20]]   ;;  %s5945_s16 = smov 0  }
  0x13   :  { %6542 = sst [smem:[#allocation9_spill]] %s5820_s29 }
  0x14   :  { %6543 = sst [smem:[#allocation10_spill]] %s5825_s3 }
  0x15   :  { %6544 = sst [smem:[#allocation11_spill]] %s5830_s8 }
  0x16   :  { %6545 = sst [smem:[#allocation12_spill]] %s5835_s14 }
  0x17   :  { %6546 = sst [smem:[#allocation13_spill]] %s5840_s19 }
  0x18   :  { %6547 = sst [smem:[#allocation14_spill]] %s5845_s24 }
  0x19   :  { %s5850_s30 = sld [smem:[%s6516_s0 + %s5760_s26]]  }
  0x1a   :  { %s5855_s6 = sld [smem:[%s6516_s0 + %s5761_s1]]  }
  0x1b   :  { %s5860_s12 = sld [smem:[%s6516_s0 + %s5762_s7]]   ;;  %s5766_s7 = smov 18  }
  0x1c   :  { %s5865_s20 = sld [smem:[%s6516_s0 + %s5763_s15]]   ;;  %s5767_s15 = smov 19  }
  0x1d   :  { %s5870_s27 = sld [smem:[%s6516_s0 + %s5764_s22]]   ;;  %s5768_s22 = smov 20  }
  0x1e   :  { %s5875_s4 = sld [smem:[%s6516_s0 + %s5765_s28]]   ;;  %s5769_s28 = smov 21  }
  0x1f   :  { %6548 = sst [smem:[#allocation15_spill]] %s5850_s30 }
  0x20   :  { %6549 = sst [smem:[#allocation16_spill]] %s5855_s6 }
  0x21   :  { %6550 = sst [smem:[#allocation17_spill]] %s5860_s12 }
  0x22   :  { %6551 = sst [smem:[#allocation18_spill]] %s5865_s20 }
  0x23   :  { %6552 = sst [smem:[#allocation19_spill]] %s5870_s27 }
  0x24   :  { %6553 = sst [smem:[#allocation20_spill]] %s5875_s4 }
  0x25   :  { %s5880_s12 = sld [smem:[%s6516_s0 + %s5766_s7]]   ;;  %s5770_s7 = smov 22  }
  0x26   :  { %s5885_s20 = sld [smem:[%s6516_s0 + %s5767_s15]]   ;;  %s5771_s15 = smov 23  }
  0x27   :  { %s5890_s27 = sld [smem:[%s6516_s0 + %s5768_s22]]   ;;  %s5772_s22 = smov 24  }
  0x28   :  { %s5895_s4 = sld [smem:[%s6516_s0 + %s5769_s28]]   ;;  %s5773_s28 = smov 25  }
  0x2b   :  { %6554 = sst [smem:[#allocation21_spill]] %s5880_s12 }
  0x2c   :  { %6555 = sst [smem:[#allocation22_spill]] %s5885_s20 }
  0x2d   :  { %6556 = sst [smem:[#allocation23_spill]] %s5890_s27 }
  0x2e   :  { %6557 = sst [smem:[#allocation24_spill]] %s5895_s4 }
  0x2f   :  { %s5900_s12 = sld [smem:[%s6516_s0 + %s5770_s7]]   ;;  %s5774_s7 = smov 26  }
  0x30   :  { %s5905_s20 = sld [smem:[%s6516_s0 + %s5771_s15]]   ;;  %s5775_s15 = smov 27  }
  0x31   :  { %s5910_s27 = sld [smem:[%s6516_s0 + %s5772_s22]]   ;;  %s5776_s22 = smov 28  }
  0x32   :  { %s5915_s4 = sld [smem:[%s6516_s0 + %s5773_s28]]   ;;  %s5777_s28 = smov 29  }
  0x35   :  { %6558 = sst [smem:[#allocation25_spill]] %s5900_s12 }
  0x36   :  { %6559 = sst [smem:[#allocation26_spill]] %s5905_s20 }
  0x37   :  { %6560 = sst [smem:[#allocation27_spill]] %s5910_s27 }
  0x38   :  { %6561 = sst [smem:[#allocation28_spill]] %s5915_s4 }
  0x39   :  { %s5920_s12 = sld [smem:[%s6516_s0 + %s5774_s7]]   ;;  %s5937_s7 = smov 0  }
  0x3a   :  { %s5925_s20 = sld [smem:[%s6516_s0 + %s5775_s15]]   ;;  %s5943_s15 = smov 0  }
  0x3b   :  { %s5930_s27 = sld [smem:[%s6516_s0 + %s5776_s22]]  }
  0x3c   :  { %s5935_s4 = sld [smem:[%s6516_s0 + %s5777_s28]]  }
  0x40   :  { %6562 = sst [smem:[#allocation29_spill]] %s5925_s20 }
  0x41   :  { %6563 = sst [smem:[#allocation30_spill]] %s5930_s27 }
  0x42   :  { %6564 = sst [smem:[#allocation31_spill]] %s5935_s4 }
  0x43 LB: > { %6565 = sst [smem:[#allocation32_spill]] %s5731_s7  ;;  %s78_s0 = sadd.s32 1, %s5739_s11  ;;  %s5747_s16 = sphi %s5945_s16, %s69_s16   ;;  %s5743_s15 = sphi %s5943_s15, %s6648_s15   ;;  %s5739_s11 = sphi %s5941_s11, %s6647_s11   ;;  %s5735_s10 = sphi %s5939_s10, %s6646_s10   ;;  %s5731_s7 = sphi %s5937_s7, %s6645_s7  }
  0x44   : > { %6566 = sst [smem:[#allocation33_spill]] %s5739_s11  ;;  %s81_s18 = sadd.s32 1, %s5743_s15 }
  0x45   : > { %6567 = sst [smem:[#allocation34_spill]] %s5743_s15  ;;  %p79_p0 = scmp.ge.s32.totalorder %s78_s0, 2 }
  0x46   : > { %6568 = sst [smem:[#allocation35_spill]] %s5747_s16  ;;  %p4862_p1 = scmp.ge.s32.totalorder %s5747_s16, 1 }
  0x47   : > { %p1062_p2 = scmp.lt.s32.totalorder %s5747_s16, 5  ;;  %s6650_s0 = smov (%p79_p0, %s78_s0), 0 }
  0x48   : > { %6569 = sst [smem:[#allocation36_spill]] %s6650_s0  ;;  %s6652_s18 = smov (!%p79_p0, %s81_s18), %s5743_s15 }
  0x49   : > { %p1063_p3 = pnand %p4862_p1, %p1062_p2  ;;  %p83_p4 = scmp.ge.s32.totalorder %s6652_s18, 2 }
  0x4b   : > { %s6654_s18 = smov (%p83_p4, %s6652_s18), 0  ;;  %1066 = sbr.rel (%p1063_p3) target bundleno = 3954 (0xf72), region = 136 }
  0x4c   : > { %6570 = sst [smem:[#allocation37_spill]] %s6654_s18 }
  0x50   : > { %p1240_p5 = scmp.lt.s32.totalorder %s5735_s10, 1  ;;  %s6571_s5 = sld [smem:[#allocation3_spill]] }
  0x51   : > { %s6572_s9 = sld [smem:[#allocation4_spill]]  ;;  %p1244_p6 = scmp.lt.s32.totalorder %s5731_s7, 1 }
  0x52   : > { %s6573_s13 = sld [smem:[#allocation5_spill]]  ;;  %s6656_s10 = smov (!%p1240_p5, %s5735_s10), 1 }
  0x53   : > { %s6574_s17 = sld [smem:[#allocation6_spill]]  ;;  %s6522_s23 = sshll.u32 %s6656_s10, 3 }
  0x54   : > { %s6575_s21 = sld [smem:[#allocation7_spill]] }
  0x55   : > { %s6576_s25 = sld [smem:[#allocation8_spill]] }
  0x56   : > { %s6577_s29 = sld [smem:[#allocation9_spill]]  ;;  %s5979_s26 = scalar_lea.vmem %s6571_s5, %s6522_s23 }
  0x57   : > { %s6578_s3 = sld [smem:[#allocation10_spill]] }
  0x58   : > { %6581 = sst [smem:[#allocation38_spill]] %s6656_s10 }
  0x59   : > { %s5973_s22 = scalar_select %p1244_p6, %s5731_s7, 1 }
  0x5a   : > { %s6583_s24 = sld [smem:[#allocation14_spill]] }
  0x5b   : > { %s6584_s30 = sld [smem:[#allocation15_spill]]  ;;  %s5037_s28 = sshll.u32 %s5973_s22, 6 }
  0x5c   : > { %6585 = sst [smem:[#allocation39_spill]] %s5979_s26  ;;  %s5983_s2 = scalar_lea.vmem %s6572_s9, %s5037_s28 }
  0x5d   : > { %s6586_s6 = sld [smem:[#allocation16_spill]]  ;;  %s5986_s0 = scalar_lea.vmem %s6573_s13, %s5037_s28 }
  0x5e   : > { %s6587_s1 = sld [smem:[#allocation17_spill]]  ;;  %s5989_s11 = scalar_lea.vmem %s6574_s17, %s5037_s28 }
  0x5f   : > { %6588 = sst [smem:[#allocation40_spill]] %s5983_s2  ;;  %s4870_s27 = sshll.u32 %s5973_s22, 2 }
  0x60   : > { %s6589_s18 = sld [smem:[#allocation18_spill]]  ;;  %s5993_s7 = scalar_lea.vmem %s6575_s21, %s4870_s27 }
  0x61   : > { %6590 = sst [smem:[#allocation41_spill]] %s5986_s0  ;;  %s5996_s5 = scalar_lea.vmem %s6576_s25, %s4870_s27 }
  0x62   : > { %s6591_s15 = sld [smem:[#allocation19_spill]]  ;;  %s5999_s9 = scalar_lea.vmem %s6577_s29, %s4870_s27 }
  0x63   : > { %6592 = sst [smem:[#allocation42_spill]] %s5989_s11  ;;  %s5040_s13 = sshll.u32 %s5973_s22, 4 }
  0x64   : > { %s6593_s16 = sld [smem:[#allocation20_spill]]  ;;  %s6003_s17 = scalar_lea.vmem %s6578_s3, %s5040_s13 }
  0x65   : > { %s6594_s20 = sld [smem:[#allocation21_spill]]  ;;  %s6015_s29 = scalar_lea.vmem %s6584_s30, %s5037_s28 }
  0x66   : > { %6595 = sst [smem:[#allocation43_spill]] %s5993_s7  ;;  %s6021_s8 = scalar_lea.vmem %s6587_s1, %s4870_s27 }
  0x67   : > { %s6596_s23 = sld [smem:[#allocation22_spill]]  ;;  %s6024_s11 = scalar_lea.vmem %s6589_s18, %s4870_s27 }
  0x68   : > { %6597 = sst [smem:[#allocation44_spill]] %s5996_s5  ;;  %s6012_s5 = scalar_lea.vmem %s6583_s24, %s5037_s28 }
  0x69   : > { %s6598_s26 = sld [smem:[#allocation23_spill]]  ;;  %s6027_s14 = scalar_lea.vmem %s6591_s15, %s4870_s27 }
  0x6a   : > { %6599 = sst [smem:[#allocation45_spill]] %s5999_s9  ;;  %s6608_s9 = smov %s6656_s10 }
  0x6b   : > { %s6600_s2 = sld [smem:[#allocation24_spill]]  ;;  %s6030_s21 = scalar_lea.vmem %s6593_s16, %s5040_s13 }
  0x6c   : > { %s6601_s0 = sld [smem:[#allocation25_spill]]  ;;  %s1319_s10 = scalar_lea.vmem %s6594_s20, %s5973_s22 }
  0x6d   : > { %6602 = sst [smem:[#allocation46_spill]] %s6003_s17  ;;  %s6018_s17 = scalar_lea.vmem %s6586_s6, %s5037_s28 }
  0x6e   : > { %s6603_s4 = sld [smem:[#allocation27_spill]]  ;;  %s1322_s19 = scalar_lea.vmem %s6596_s23, %s5973_s22 }
  0x6f   : > { %s6604_s7 = sld [smem:[#allocation26_spill]]  ;;  %s1325_s24 = scalar_lea.vmem %s6598_s26, %s5973_s22 }
  0x70   : > { %s6605_s25 = sld [smem:[#allocation28_spill]]  ;;  %s1347_s1 = scalar_lea.vmem %s5920_s12, %s5973_s22 }
  0x71   : > { %6606 = sst [smem:[#allocation47_spill]] %s6012_s5  ;;  %s6039_s5 = scalar_lea.vmem %s6600_s2, %s5040_s13 }
  0x72   : > { %6607 = sst [smem:[#allocation48_spill]] %s6015_s29  ;;  %s1333_s30 = scalar_lea.vmem %s6601_s0, %s5973_s22 }
  0x73   : > { %s6609_s3 = sld [smem:[#allocation31_spill]]  ;;  %s5046_s29 = sshll.u32 %s5973_s22, 5 }
  0x74   : > { %6610 = sst [smem:[#allocation38_spill]] %s6018_s17  ;;  %s1341_s6 = scalar_lea.vmem %s6603_s4, %s5973_s22 }
  0x75   : > { %6611 = sst [smem:[#allocation49_spill]] %s6021_s8  ;;  %s6047_s28 = scalar_lea.vmem %s6604_s7, %s5046_s29 }
  0x76   : > { %6612 = sst [smem:[#allocation50_spill]] %s6024_s11  ;;  %s1344_s17 = scalar_lea.vmem %s6605_s25, %s5973_s22 }
  0x77   : > { %s6613_s8 = sshll.u32 %s6608_s9, 3  ;;  %s6614_s11 = sld [smem:[#allocation32_spill]] }
  0x79   : > { %s6056_s18 = scalar_lea.vmem %s6609_s3, %s6613_s8 }
  0x7d   : > { %p4891_p7 = scmp.ne.s32.totalorder %s6614_s11, 0 }
  0x7e   : > { %s6615_s27 = sld [smem:[#allocation39_spill]] (!%p4891_p7) }
  0x7f   : > { %1356 = sbr.rel (%p4891_p7) target bundleno = 134 (0x86), region = 140 }
  0x84   : > { %v1357_v0 = vld [vmem:[%s6615_s27] sm:$0xff]  ;;  %vm1358_vm0 = vcmask 261120  }
  0x85   : > { %1359 = vst.msk [vmem:[#allocation2] sm:$0xff] %vm1358_vm0, %v1357_v0 }
  0x86 PF: > { %s6616_s13 = sld [smem:[#allocation40_spill]]  ;;  %v5778_v2 = vmov 0.0   ;;  %vm5779_vm1 = vmmov 0   ;;  %vm1419_vm2 = vcmask 261120   ;;  %vm2131_vm3 = vcmask 64512  }
  0x87   : > { %5178 = vmatprep.subr.bf16.mxu0 %v5778_v2  ;;  %5186 = vmatprep.subr.bf16.mxu1 %v5778_v2  ;;  %s6617_s9 = sld [smem:[#allocation41_spill]]  ;;  %vm2375_vm4 = vcmask 1043456   ;;  %vm4336_vm5 = vcmask 523264  }
  0x88   : > { %5182 = vmatprep.mubr.msk.bf16.mxu0 %vm5779_vm1, %v5778_v2  ;;  %5190 = vmatprep.mubr.msk.bf16.mxu1 %vm5779_vm1, %v5778_v2  ;;  %s6618_s25 = sld [smem:[#allocation42_spill]] }
  0x89   : > { %s6619_s29 = sld [smem:[#allocation44_spill]] }
  0x8a   : > { %s6620_s3 = sld [smem:[#allocation43_spill]] }
  0x8b   : > { %s6621_s8 = sld [smem:[#allocation45_spill]] }
  0x8c   : > { %v5615_v1 = vld [vmem:[%s6616_s13 + $0x8] sm:$0xff]   ;;  %v5616_v3 = vld [vmem:[%s6616_s13 + $0x18] sm:$0xff]   ;;  %v5617_v4 = vld [vmem:[%s6616_s13] sm:$0xff]   ;;  %s6622_s20 = sld [smem:[#allocation46_spill]] }
  0x8d   : > { %5179 = vmatpush3.bf16.msra.mxu0 %v5615_v1  ;;  %5187 = vmatpush3.bf16.msra.mxu1 %v5616_v3  ;;  %v5618_v5 = vld [vmem:[%s6616_s13 + $0x10] sm:$0xff]   ;;  %v6072_v6 = vld [vmem:[#allocation2] sm:$0xff]  ;;  %v5619_v8 = vld [vmem:[%s6616_s13 + $0x28] sm:$0xff]   ;;  %s6623_s4 = sld [smem:[#allocation11_spill]] }
  0x8e   : > { %5180 = vmatprep.subr.bf16.mxu0 %v5778_v2  ;;  %5188 = vmatprep.subr.bf16.mxu1 %v5778_v2  ;;  %v6076_v7 = vpack.c.bf16 %v6072_v6, %v6072_v6  ;;  %v5620_v9 = vld [vmem:[%s6616_s13 + $0x38] sm:$0xff]   ;;  %v5621_v10 = vld [vmem:[%s6616_s13 + $0x20] sm:$0xff]   ;;  %v5622_v11 = vld [vmem:[%s6616_s13 + $0x30] sm:$0xff]   ;;  %s6625_s11 = sld [smem:[#allocation47_spill]] }
  0x8f   : > { %v5623_v12 = vld [vmem:[%s6617_s9 + $0x8] sm:$0xff]   ;;  %v5624_v13 = vld [vmem:[%s6617_s9 + $0x18] sm:$0xff]   ;;  %v5625_v14 = vld [vmem:[%s6617_s9] sm:$0xff]   ;;  %s6626_s15 = sld [smem:[#allocation12_spill]] }
  0x90   : > { %v5626_v15 = vld [vmem:[%s6617_s9 + $0x10] sm:$0xff]   ;;  %v5627_v16 = vld [vmem:[%s6617_s9 + $0x28] sm:$0xff]   ;;  %v5628_v17 = vld [vmem:[%s6617_s9 + $0x38] sm:$0xff]   ;;  %s6627_s16 = sld [smem:[#allocation13_spill]] }
  0x91   : > { %5181 = vmatpush3.bf16.msra.mxu0 %v5617_v4  ;;  %5189 = vmatpush3.bf16.msra.mxu1 %v5618_v5  ;;  %v5629_v18 = vld [vmem:[%s6617_s9 + $0x20] sm:$0xff]   ;;  %v5630_v19 = vld [vmem:[%s6617_s9 + $0x30] sm:$0xff]   ;;  %v5631_v20 = vld [vmem:[%s6618_s25 + $0x8] sm:$0xff]   ;;  %s6630_s26 = sld [smem:[#allocation48_spill]] }
  0x92   : > { %5194 = vmatprep.subr.bf16.mxu0 %v5778_v2  ;;  %5202 = vmatprep.subr.bf16.mxu1 %v5778_v2  ;;  %v5632_v21 = vld [vmem:[%s6618_s25] sm:$0xff]   ;;  %v5633_v22 = vld [vmem:[%s6618_s25 + $0x18] sm:$0xff]   ;;  %v5634_v23 = vld [vmem:[%s6618_s25 + $0x10] sm:$0xff]   ;;  %s6631_s2 = sld [smem:[#allocation39_spill]] }
  0x93   : > { %v5635_v24 = vld [vmem:[%s6618_s25 + $0x28] sm:$0xff]   ;;  %v5636_v25 = vld [vmem:[%s6618_s25 + $0x20] sm:$0xff]   ;;  %v5637_v26 = vld [vmem:[%s6618_s25 + $0x38] sm:$0xff]   ;;  %s6624_s7 = scalar_lea.vmem %s6623_s4, %s5973_s22  ;;  %s6632_s27 = sld [smem:[#allocation38_spill]] }
  0x94   : > { %5183 = vmatmul.mubr.msk.bf16.vlgmr.msra.gmra.mxu0 %vm1419_vm2, %v6076_v7  ;;  %5191 = vmatmul.mubr.msk.bf16.vlgmr.msra.gmra.mxu1 %vm1419_vm2, %v6076_v7  ;;  %v5638_v27 = vld [vmem:[%s6618_s25 + $0x30] sm:$0xff]   ;;  %v4908_v43 = vld [vmem:[%s6619_s29] ss:$0 sm:$0xff]  ;;  %v4909_v45 = vld [vmem:[%s6619_s29 + $0x1] ss:$0 sm:$0xff]  ;;  %s6633_s13 = sld [smem:[#allocation50_spill]] }
  0x95   : > { %5195 = vmatpush3.bf16.msra.mxu0 %v5619_v8  ;;  %5203 = vmatpush3.bf16.msra.mxu1 %v5620_v9  ;;  %v4892_v53 = vld [vmem:[%s6620_s3] ss:$0 sm:$0xff]  ;;  %v4893_v56 = vld [vmem:[%s6620_s3 + $0x1] ss:$0 sm:$0xff]  ;;  %v4910_v61 = vld [vmem:[%s6619_s29 + $0x2] ss:$0 sm:$0xff]  ;;  %s6628_s0 = scalar_lea.vmem %s6626_s15, %s5973_s22 }
  0x96   : > { %5196 = vmatprep.subr.bf16.mxu0 %v5778_v2  ;;  %5204 = vmatprep.subr.bf16.mxu1 %v5778_v2  ;;  %v4911_v0 = vld [vmem:[%s6619_s29 + $0x3] ss:$0 sm:$0xff]  ;;  %s6629_s23 = scalar_lea.vmem %s6627_s16, %s5973_s22  ;;  %s6634_s9 = sld [smem:[#allocation49_spill]] }
  0x97   : > { %5198 = vmatprep.mubr.msk.bf16.mxu0 %vm5779_vm1, %v5778_v2  ;;  %5206 = vmatprep.mubr.msk.bf16.mxu1 %vm5779_vm1, %v5778_v2 }
  0x99   : > { %5197 = vmatpush3.bf16.msra.mxu0 %v5621_v10  ;;  %5205 = vmatpush3.bf16.msra.mxu1 %v5622_v11 }
  0x9a   : > { %5210 = vmatprep.subr.bf16.mxu0 %v5778_v2  ;;  %5218 = vmatprep.subr.bf16.mxu1 %v5778_v2 }
  0x9c   : > { %5199 = vmatmul.mubr.msk.bf16.vlgmr.msra.gmra.mxu0 %vm1419_vm2, %v6076_v7  ;;  %5207 = vmatmul.mubr.msk.bf16.vlgmr.msra.gmra.mxu1 %vm1419_vm2, %v6076_v7 }
  0x9d   : > { %5211 = vmatpush3.bf16.msra.mxu0 %v5623_v12  ;;  %5219 = vmatpush3.bf16.msra.mxu1 %v5624_v13  ;;  %v4894_v13 = vld [vmem:[%s6620_s3 + $0x2] ss:$0 sm:$0xff] }
  0x9e   : > { %5212 = vmatprep.subr.bf16.mxu0 %v5778_v2  ;;  %5220 = vmatprep.subr.bf16.mxu1 %v5778_v2 }
  0x9f   : > { %5214 = vmatprep.mubr.msk.bf16.mxu0 %vm5779_vm1, %v5778_v2  ;;  %5222 = vmatprep.mubr.msk.bf16.mxu1 %vm5779_vm1, %v5778_v2 }
  0xa1   : > { %5213 = vmatpush3.bf16.msra.mxu0 %v5625_v14  ;;  %5221 = vmatpush3.bf16.msra.mxu1 %v5626_v15 }
  0xa2   : > { %5226 = vmatprep.subr.bf16.mxu0 %v5778_v2  ;;  %5234 = vmatprep.subr.bf16.mxu1 %v5778_v2 }
  0xa4   : > { %5215 = vmatmul.mubr.msk.bf16.vlgmr.msra.gmra.mxu0 %vm1419_vm2, %v6076_v7  ;;  %5223 = vmatmul.mubr.msk.bf16.vlgmr.msra.gmra.mxu1 %vm1419_vm2, %v6076_v7 }
  0xa5   : > { %5227 = vmatpush3.bf16.msra.mxu0 %v5627_v16  ;;  %5235 = vmatpush3.bf16.msra.mxu1 %v5628_v17  ;;  %v4895_v16 = vld [vmem:[%s6620_s3 + $0x3] ss:$0 sm:$0xff] }
  0xa6   : > { %5228 = vmatprep.subr.bf16.mxu0 %v5778_v2  ;;  %5236 = vmatprep.subr.bf16.mxu1 %v5778_v2 }
  0xa7   : > { %5230 = vmatprep.mubr.msk.bf16.mxu0 %vm5779_vm1, %v5778_v2  ;;  %5238 = vmatprep.mubr.msk.bf16.mxu1 %vm5779_vm1, %v5778_v2 }
  0xa9   : > { %5229 = vmatpush3.bf16.msra.mxu0 %v5629_v18  ;;  %5237 = vmatpush3.bf16.msra.mxu1 %v5630_v19 }
  0xaa   : > { %5242 = vmatprep.subr.bf16.mxu0 %v5778_v2  ;;  %5250 = vmatprep.subr.bf16.mxu1 %v5778_v2 }
  0xac   : > { %5231 = vmatmul.mubr.msk.bf16.vlgmr.msra.gmra.mxu0 %vm1419_vm2, %v6076_v7  ;;  %5239 = vmatmul.mubr.msk.bf16.vlgmr.msra.gmra.mxu1 %vm1419_vm2, %v6076_v7 }
  0xad   : > { %5246 = vmatprep.mubr.msk.bf16.mxu0 %vm5779_vm1, %v5778_v2  ;;  %5254 = vmatprep.mubr.msk.bf16.mxu1 %vm5779_vm1, %v5778_v2 }
  0xae   : > { %5243 = vmatpush3.bf16.msra.mxu0 %v5631_v20  ;;  %5251 = vmatpush3.bf16.msra.mxu1 %v5633_v22 }
  0xaf   : > { %5244 = vmatprep.subr.bf16.mxu0 %v5778_v2  ;;  %5252 = vmatprep.subr.bf16.mxu1 %v5778_v2 }
  0xb2   : > { %5245 = vmatpush3.bf16.msra.mxu0 %v5632_v21  ;;  %5253 = vmatpush3.bf16.msra.mxu1 %v5634_v23 }
  0xb3   : > { %5258 = vmatprep.subr.bf16.mxu0 %v5778_v2  ;;  %5266 = vmatprep.subr.bf16.mxu1 %v5778_v2 }
  0xb5   : > { %5247 = vmatmul.mubr.msk.bf16.vlgmr.msra.gmra.mxu0 %vm1419_vm2, %v6076_v7  ;;  %5255 = vmatmul.mubr.msk.bf16.vlgmr.msra.gmra.mxu1 %vm1419_vm2, %v6076_v7 }
  0xb6   : > { %5259 = vmatpush3.bf16.msra.mxu0 %v5635_v24  ;;  %5262 = vmatprep.mubr.msk.bf16.mxu0 %vm5779_vm1, %v5778_v2 }
  0xb7   : > { %5260 = vmatprep.subr.bf16.mxu0 %v5778_v2  ;;  %5267 = vmatpush3.bf16.msra.mxu1 %v5637_v26  ;;  %v4924_v26 = vld [vmem:[%s6621_s8] ss:$0 sm:$0xff] }
  0xb8   : > { %5268 = vmatprep.subr.bf16.mxu1 %v5778_v2  ;;  %5270 = vmatprep.mubr.msk.bf16.mxu1 %vm5779_vm1, %v5778_v2 }
  0xba   : > { %5261 = vmatpush3.bf16.msra.mxu0 %v5636_v25 }
  0xbb   : > { %5274 = vmatprep.subr.bf16.mxu0 %v5778_v2  ;;  %5269 = vmatpush3.bf16.msra.mxu1 %v5638_v27 }
  0xbc   : > { %5280 = vmatprep.subr.bf16.mxu1 %v5778_v2 }
  0xbd   : > { %5263 = vmatmul.mubr.msk.bf16.vlgmr.msra.gmra.mxu0 %vm1419_vm2, %v6076_v7 }
  0xbe   : > { %5276 = vmatprep.mubr.msk.bf16.mxu0 %vm5779_vm1, %v5778_v2  ;;  %5271 = vmatmul.mubr.msk.bf16.vlgmr.msra.gmra.mxu1 %vm1419_vm2, %v6076_v7 }
  0xbf   : > { %5282 = vmatprep.mubr.msk.bf16.mxu1 %vm5779_vm1, %v5778_v2 }
 0x154   : > { %v1457_v28 = vpop.f32.mrf.mxu0  ;;  %v1509_v29 = vpop.f32.mrf.mxu1 }
 0x155   : > { %v1458_v62 = vadd.f32 %v4892_v53, %v1457_v28  ;;  %v1510_v1 = vadd.f32 %v4893_v56, %v1509_v29 }
 0x156   : > { %v5184_v30 = vpop.f32.mrf.mxu0  ;;  %v5192_v31 = vpop.f32.mrf.mxu1 }
 0x157   : > { %v2123_v9 = vpack.c.bf16 %v1458_v62, %v1458_v62  ;;  %v2124_v12 = vpack.c.bf16 %v1510_v1, %v1510_v1  ;;  %v4925_v30 = vld [vmem:[%s6621_s8 + $0x1] ss:$0 sm:$0xff] }
 0x158   : > { %v1460_v32 = vpop.f32.mrf.mxu0  ;;  %v1512_v33 = vpop.f32.mrf.mxu1 }
 0x15a   : > { %v5185_v34 = vpop.f32.mrf.mxu0  ;;  %v5193_v35 = vpop.f32.mrf.mxu1 }
 0x15c   : > { %v1561_v36 = vpop.f32.mrf.mxu0  ;;  %v1613_v37 = vpop.f32.mrf.mxu1 }
 0x15d   : > { %v1562_v21 = vadd.f32 %v4894_v13, %v1561_v36  ;;  %v1614_v23 = vadd.f32 %v4895_v16, %v1613_v37 }
 0x15e   : > { %v5200_v38 = vpop.f32.mrf.mxu0  ;;  %v5208_v39 = vpop.f32.mrf.mxu1 }
 0x15f   : > { %v2125_v24 = vpack.c.bf16 %v1562_v21, %v1562_v21  ;;  %v2126_v25 = vpack.c.bf16 %v1614_v23, %v1614_v23 }
 0x160   : > { %v1564_v40 = vpop.f32.mrf.mxu0  ;;  %v1616_v41 = vpop.f32.mrf.mxu1 }
 0x162   : > { %v5201_v42 = vpop.f32.mrf.mxu0  ;;  %v5209_v44 = vpop.f32.mrf.mxu1 }
 0x164   : > { %v1709_v46 = vpop.f32.mrf.mxu0  ;;  %v1761_v48 = vpop.f32.mrf.mxu1 }
 0x165   : > { %v1710_v47 = vadd.f32 %v4908_v43, %v1709_v46  ;;  %v1762_v49 = vadd.f32 %v4909_v45, %v1761_v48 }
 0x166   : > { %v5216_v50 = vpop.f32.mrf.mxu0  ;;  %v5224_v52 = vpop.f32.mrf.mxu1 }
 0x167   : > { %v2127_v51 = vpack.c.bf16 %v1710_v47, %v1710_v47  ;;  %v2128_v54 = vpack.c.bf16 %v1762_v49, %v1762_v49 }
 0x168   : > { %v1712_v55 = vpop.f32.mrf.mxu0  ;;  %v1764_v58 = vpop.f32.mrf.mxu1 }
 0x169   : > { %v2136_v57 = vsel %vm2131_vm3, %v2127_v51, 0  ;;  %v2182_v59 = vsel %vm2131_vm3, %v2128_v54, 0 }
 0x16a   : > { %v5217_v60 = vpop.f32.mrf.mxu0  ;;  %5275 = vmatpush3.bf16.xpose.msra.mxu0 %v2136_v57  ;;  %v5225_v63 = vpop.f32.mrf.mxu1  ;;  %5281 = vmatpush3.bf16.xpose.msra.mxu1 %v2182_v59 }
 0x16b   : > { %5286 = vmatprep.subr.bf16.mxu0 %v5778_v2  ;;  %5292 = vmatprep.subr.bf16.mxu1 %v5778_v2 }
 0x16c   : > { %v1813_v3 = vpop.f32.mrf.mxu0  ;;  %v1865_v5 = vpop.f32.mrf.mxu1 }
 0x16d   : > { %v1814_v4 = vadd.f32 %v4910_v61, %v1813_v3  ;;  %v1866_v7 = vadd.f32 %v4911_v0, %v1865_v5 }
 0x16e   : > { %v5232_v8 = vpop.f32.mrf.mxu0  ;;  %v5240_v11 = vpop.f32.mrf.mxu1 }
 0x16f   : > { %v2129_v10 = vpack.c.bf16 %v1814_v4, %v1814_v4  ;;  %v2130_v14 = vpack.c.bf16 %v1866_v7, %v1866_v7 }
 0x170   : > { %v1816_v15 = vpop.f32.mrf.mxu0  ;;  %v1868_v18 = vpop.f32.mrf.mxu1 }
 0x171   : > { %v2228_v17 = vsel %vm2131_vm3, %v2129_v10, 0  ;;  %5277 = vmatmul.mubr.msk.bf16.vlgmr.msra.gmra.mxu0 %vm2131_vm3, %v2123_v9  ;;  %v2274_v19 = vsel %vm2131_vm3, %v2130_v14, 0  ;;  %5283 = vmatmul.mubr.msk.bf16.vlgmr.msra.gmra.mxu1 %vm2131_vm3, %v2124_v12 }
 0x172   : > { %v5233_v20 = vpop.f32.mrf.mxu0  ;;  %5287 = vmatpush3.bf16.xpose.msra.mxu0 %v2228_v17  ;;  %v5241_v22 = vpop.f32.mrf.mxu1  ;;  %5293 = vmatpush3.bf16.xpose.msra.mxu1 %v2274_v19 }
 0x173   : > { %5288 = vmatprep.mubr.msk.bf16.mxu0 %vm5779_vm1, %v5778_v2  ;;  %5294 = vmatprep.mubr.msk.bf16.mxu1 %vm5779_vm1, %v5778_v2 }
 0x174   : > { %5298 = vmatprep.subr.bf16.mxu0 %v5778_v2  ;;  %5304 = vmatprep.subr.bf16.mxu1 %v5778_v2 }
 0x175   : > { %v1961_v27 = vpop.f32.mrf.mxu0  ;;  %v2013_v33 = vpop.f32.mrf.mxu1 }
 0x176   : > { %v1962_v28 = vadd.f32 %v4924_v26, %v1961_v27  ;;  %v2014_v35 = vadd.f32 %v4925_v30, %v2013_v33 }
 0x177   : > { %v5248_v29 = vpop.f32.mrf.mxu0  ;;  %v5256_v37 = vpop.f32.mrf.mxu1 }
 0x178   : > { %v2368_v31 = vpack.c.bf16 %v1962_v28, %v1962_v28  ;;  %v2369_v38 = vpack.c.bf16 %v2014_v35, %v2014_v35  ;;  %v4927_v37 = vld [vmem:[%s6621_s8 + $0x3] ss:$0 sm:$0xff] }
 0x179   : > { %5289 = vmatmul.mubr.msk.bf16.vlgmr.msra.gmra.mxu0 %vm2131_vm3, %v2125_v24  ;;  %5295 = vmatmul.mubr.msk.bf16.vlgmr.msra.gmra.mxu1 %vm2131_vm3, %v2126_v25  ;;  %v1964_v32 = vpop.f32.mrf.mxu0  ;;  %v2016_v39 = vpop.f32.mrf.mxu1 }
 0x17a   : > { %5300 = vmatprep.mubr.msk.bf16.mxu0 %vm5779_vm1, %v5778_v2  ;;  %5306 = vmatprep.mubr.msk.bf16.mxu1 %vm5779_vm1, %v5778_v2  ;;  %v2377_v34 = vsel %vm2375_vm4, %v2368_v31, 0  ;;  %v2423_v41 = vsel %vm2375_vm4, %v2369_v38, 0 }
 0x17b   : > { %v5249_v36 = vpop.f32.mrf.mxu0  ;;  %5299 = vmatpush3.bf16.msra.mxu0 %v2377_v34  ;;  %v5257_v42 = vpop.f32.mrf.mxu1  ;;  %5305 = vmatpush3.bf16.msra.mxu1 %v2423_v41  ;;  %v4926_v34 = vld [vmem:[%s6621_s8 + $0x2] ss:$0 sm:$0xff] }
 0x17c   : > { %5310 = vmatprep.subr.bf16.mxu0 %v5778_v2  ;;  %5316 = vmatprep.subr.bf16.mxu1 %v5778_v2 }
 0x17d   : > { %v6200_v40 = vpop.f32.mrf.mxu0 }
 0x17e   : > { %v6204_v45 = vpop.f32.mrf.mxu1  ;;  %v2066_v36 = vadd.f32 %v4926_v34, %v6200_v40 }
 0x17f   : > { %v5264_v43 = vpop.f32.mrf.mxu0  ;;  %v2118_v42 = vadd.f32 %v4927_v37, %v6204_v45 }
 0x180   : > { %v5272_v47 = vpop.f32.mrf.mxu1  ;;  %v2370_v41 = vpack.c.bf16 %v2066_v36, %v2066_v36 }
 0x181   : > { %v2068_v44 = vpop.f32.mrf.mxu0 }
 0x182   : > { %v2120_v48 = vpop.f32.mrf.mxu1  ;;  %v2469_v47 = vsel %vm2375_vm4, %v2370_v41, 0  ;;  %v4952_v41 = vld [vmem:[%s6624_s7] ss:$0 sm:$0xff] }
 0x183   : > { %v5265_v46 = vpop.f32.mrf.mxu0  ;;  %v2371_v48 = vpack.c.bf16 %v2118_v42, %v2118_v42 }
 0x184   : > { %v5273_v49 = vpop.f32.mrf.mxu1 }
 0x185   : > { %v2515_v45 = vsel %vm2375_vm4, %v2371_v48, 0 }
 0x231   : > { %v2172_v50 = vpop.f32.mrf.mxu0  ;;  %v2218_v52 = vpop.f32.mrf.mxu1 }
 0x232   : > { %v2316_v51 = vmul.f32 0.35355338, %v2172_v50  ;;  %v2317_v54 = vmul.f32 0.35355338, %v2218_v52 }
 0x233   : > { %v5278_v53 = vpop.f32.mrf.mxu0  ;;  %v5284_v55 = vpop.f32.mrf.mxu1 }
 0x234   : > { %v2320_v56 = vsel %vm2131_vm3, %v2316_v51, -inf  ;;  %v2323_v61 = vsel %vm2131_vm3, %v2317_v54, -inf }
 0x235   : > { %2321 = vmax.xlane.f32.xlu0 %v2320_v56  ;;  %v2175_v57 = vpop.f32.mrf.mxu0  ;;  %v2221_v58 = vpop.f32.mrf.mxu1 }
 0x236   : > { %v2562_v58 = vld [vmem:[%s6622_s20 + $0x4] sm:$0xf] }
 0x237   : > { %v5279_v59 = vpop.f32.mrf.mxu0  ;;  %v5285_v60 = vpop.f32.mrf.mxu1 }
 0x238   : > { %v2615_v59 = vsel %vm2375_vm4, %v2562_v58, 0  ;;  %v2563_v60 = vld [vmem:[%s6622_s20 + $0x8] sm:$0xf] }
 0x239   : > { %2324 = vmax.xlane.f32.xlu0 %v2323_v61  ;;  %v2264_v62 = vpop.f32.mrf.mxu0  ;;  %v2310_v63 = vpop.f32.mrf.mxu1 }
 0x23a   : > { %v2318_v0 = vmul.f32 0.35355338, %v2264_v62  ;;  %v2319_v3 = vmul.f32 0.35355338, %v2310_v63  ;;  %v2661_v63 = vsel %vm2375_vm4, %v2563_v60, 0 }
 0x23b   : > { %v5290_v1 = vpop.f32.mrf.mxu0  ;;  %v5296_v4 = vpop.f32.mrf.mxu1 }
 0x23c   : > { %v2326_v5 = vsel %vm2131_vm3, %v2318_v0, -inf  ;;  %v2329_v11 = vsel %vm2131_vm3, %v2319_v3, -inf  ;;  %v2564_v1 = vld [vmem:[%s6622_s20 + $0xc] sm:$0xf] }
 0x23d   : > { %2327 = vmax.xlane.f32.xlu1 %v2326_v5  ;;  %v2267_v7 = vpop.f32.mrf.mxu0  ;;  %v2313_v8 = vpop.f32.mrf.mxu1 }
 0x23e   : > { %v2707_v7 = vsel %vm2375_vm4, %v2564_v1, 0 }
 0x23f   : > { %v5291_v9 = vpop.f32.mrf.mxu0  ;;  %v5297_v10 = vpop.f32.mrf.mxu1 }
 0x241   : > { %2330 = vmax.xlane.f32.xlu1 %v2329_v11 }
 0x2be   : > { %v2322_v12 = vpop.xlane.xlu0 %2321 }
 0x2bf   : > { %v2332_v13 = vsub.f32 %v2316_v51, %v2322_v12  ;;  %v2561_v51 = vld [vmem:[%s6622_s20] sm:$0xf] }
 0x2c1   : > { %v2336_v14 = vmul.f32 1.442695, %v2332_v13 }
 0x2c2   : > { %v2325_v15 = vpop.xlane.xlu0 %2324 }
 0x2c3   : > { %5669 = vpow2.f32 %v2336_v14  ;;  %v2333_v16 = vsub.f32 %v2317_v54, %v2325_v15  ;;  %v2569_v54 = vsel %vm2375_vm4, %v2561_v51, 0 }
 0x2c5   : > { %v2338_v17 = vmul.f32 1.442695, %v2333_v16 }
 0x2c6   : > { %v2328_v18 = vpop.xlane.xlu1 %2327 }
 0x2c7   : > { %5671 = vpow2.f32 %v2338_v17  ;;  %v2334_v19 = vsub.f32 %v2318_v0, %v2328_v18 }
 0x2c9   : > { %v2340_v20 = vmul.f32 1.442695, %v2334_v19 }
 0x2ca   : > { %v2331_v21 = vpop.xlane.xlu1 %2330 }
 0x2cb   : > { %5673 = vpow2.f32 %v2340_v20  ;;  %v2335_v22 = vsub.f32 %v2319_v3, %v2331_v21 }
 0x2cd   : > { %v2342_v23 = vmul.f32 1.442695, %v2335_v22 }
 0x2cf   : > { %5675 = vpow2.f32 %v2342_v23 }
 0x2d0   : > { %v5670_v24 = vpop.eup %5669 }
 0x2d1   : > { %v2344_v25 = vsel %vm2131_vm3, %v5670_v24, 0.0 }
 0x2d2   : > { %2345 = vadd.xlane.f32.xlu0 %v2344_v25 }
 0x2d4   : > { %v5672_v26 = vpop.eup %5671 }
 0x2d5   : > { %v2347_v27 = vsel %vm2131_vm3, %v5672_v26, 0.0 }
 0x2d6   : > { %2348 = vadd.xlane.f32.xlu1 %v2347_v27 }
 0x2d8   : > { %v5674_v28 = vpop.eup %5673 }
 0x2d9   : > { %v2350_v29 = vsel %vm2131_vm3, %v5674_v28, 0.0 }
 0x2da   : > { %2351 = vadd.xlane.f32.xlu0 %v2350_v29 }
 0x2dc   : > { %v5676_v30 = vpop.eup %5675 }
 0x2dd   : > { %v2353_v31 = vsel %vm2131_vm3, %v5676_v30, 0.0 }
 0x2de   : > { %2354 = vadd.xlane.f32.xlu1 %v2353_v31 }
 0x35b   : > { %v2346_v32 = vpop.xlane.xlu0 %2345 }
 0x35c   : > { %5677 = vrcp.f32 %v2346_v32 }
 0x35f   : > { %v2349_v33 = vpop.xlane.xlu1 %2348 }
 0x360   : > { %5679 = vrcp.f32 %v2349_v33 }
 0x363   : > { %v2352_v35 = vpop.xlane.xlu0 %2351 }
 0x364   : > { %5681 = vrcp.f32 %v2352_v35 }
 0x367   : > { %v2355_v38 = vpop.xlane.xlu1 %2354 }
 0x368   : > { %5683 = vrcp.f32 %v2355_v38 }
 0x369   : > { %v5678_v39 = vpop.eup %5677 }
 0x36a   : > { %v2360_v43 = vmul.f32 %v5678_v39, %v5670_v24 }
 0x36c   : > { %v2364_v44 = vpack.c.bf16 %v2360_v43, %v2360_v43 }
 0x36d   : > { %v5680_v46 = vpop.eup %5679 }
 0x36e   : > { %5301 = vmatmul.mubr.msk.bf16.vlgmr.msra.gmra.mxu0 %vm2131_vm3, %v2364_v44  ;;  %v2361_v49 = vmul.f32 %v5680_v46, %v5672_v26 }
 0x36f   : > { %5311 = vmatpush3.bf16.msra.mxu0 %v2469_v47  ;;  %5312 = vmatprep.mubr.msk.bf16.mxu0 %vm5779_vm1, %v5778_v2 }
 0x370   : > { %v2365_v40 = vpack.c.bf16 %v2361_v49, %v2361_v49  ;;  %5322 = vmatprep.subr.bf16.mxu0 %v5778_v2 }
 0x371   : > { %v5682_v50 = vpop.eup %5681 }
 0x372   : > { %5307 = vmatmul.mubr.msk.bf16.vlgmr.msra.gmra.mxu1 %vm2131_vm3, %v2365_v40  ;;  %v2362_v52 = vmul.f32 %v5682_v50, %v5674_v28 }
 0x373   : > { %5317 = vmatpush3.bf16.msra.mxu1 %v2515_v45  ;;  %5318 = vmatprep.mubr.msk.bf16.mxu1 %vm5779_vm1, %v5778_v2 }
 0x374   : > { %v2366_v53 = vpack.c.bf16 %v2362_v52, %v2362_v52  ;;  %5328 = vmatprep.subr.bf16.mxu1 %v5778_v2 }
 0x375   : > { %v5684_v55 = vpop.eup %5683 }
 0x376   : > { %5313 = vmatmul.mubr.msk.bf16.vlgmr.msra.gmra.mxu0 %vm2131_vm3, %v2366_v53  ;;  %v2363_v56 = vmul.f32 %v5684_v55, %v5676_v30  ;;  %v5640_v55 = vld [vmem:[%s6625_s11 + $0x18] sm:$0xff]  }
 0x377   : > { %5323 = vmatpush3.bf16.msra.mxu0 %v2569_v54  ;;  %5324 = vmatprep.mubr.msk.bf16.mxu0 %vm5779_vm1, %v5778_v2  ;;  %v5639_v54 = vld [vmem:[%s6625_s11 + $0x8] sm:$0xff]  }
 0x378   : > { %v2367_v57 = vpack.c.bf16 %v2363_v56, %v2363_v56  ;;  %5334 = vmatprep.subr.bf16.mxu0 %v5778_v2  ;;  %v5641_v56 = vld [vmem:[%s6625_s11] sm:$0xff]  }
 0x37a   : > { %5319 = vmatmul.mubr.msk.bf16.vlgmr.msra.gmra.mxu1 %vm2131_vm3, %v2367_v57 }
 0x37b   : > { %5330 = vmatprep.mubr.msk.bf16.mxu1 %vm5779_vm1, %v5778_v2  ;;  %5329 = vmatpush3.bf16.msra.mxu1 %v2615_v59 }
 0x37c   : > { %5340 = vmatprep.subr.bf16.mxu1 %v5778_v2 }
 0x42e   : > { %v2413_v61 = vpop.f32.mrf.mxu0 }
 0x42f   : > { %v2557_v62 = vpack.c.bf16 %v2413_v61, %v2413_v61  ;;  %v4953_v61 = vld [vmem:[%s6628_s0] ss:$0 sm:$0xff] }
 0x430   : > { %v5302_v0 = vpop.f32.mrf.mxu0 }
 0x431   : > { %5325 = vmatmul.mubr.msk.bf16.vlgmr.msra.gmra.mxu0 %vm2131_vm3, %v2557_v62 }
 0x432   : > { %v2416_v3 = vpop.f32.mrf.mxu0  ;;  %v2459_v4 = vpop.f32.mrf.mxu1  ;;  %5335 = vmatpush3.bf16.msra.mxu0 %v2661_v63  ;;  %5336 = vmatprep.mubr.msk.bf16.mxu0 %vm5779_vm1, %v5778_v2  ;;  %v4954_v63 = vld [vmem:[%s6629_s23] ss:$0 sm:$0xff] }
 0x433   : > { %v2558_v5 = vpack.c.bf16 %v2459_v4, %v2459_v4  ;;  %5346 = vmatprep.subr.bf16.mxu0 %v5778_v2  ;;  %v5643_v3 = vld [vmem:[%s6625_s11 + $0x28] sm:$0xff]   ;;  %v5644_v4 = vld [vmem:[%s6625_s11 + $0x38] sm:$0xff]  }
 0x434   : > { %v5303_v8 = vpop.f32.mrf.mxu0  ;;  %v5308_v9 = vpop.f32.mrf.mxu1 }
 0x435   : > { %5331 = vmatmul.mubr.msk.bf16.vlgmr.msra.gmra.mxu1 %vm2131_vm3, %v2558_v5  ;;  %v5646_v8 = vld [vmem:[%s6625_s11 + $0x30] sm:$0xff]   ;;  %v5647_v9 = vld [vmem:[%s6630_s26 + $0x8] sm:$0xff]  }
 0x436   : > { %v2462_v10 = vpop.f32.mrf.mxu1  ;;  %v2505_v11 = vpop.f32.mrf.mxu0  ;;  %5341 = vmatpush3.bf16.msra.mxu1 %v2707_v7  ;;  %5342 = vmatprep.mubr.msk.bf16.mxu1 %vm5779_vm1, %v5778_v2  ;;  %v5645_v7 = vld [vmem:[%s6625_s11 + $0x20] sm:$0xff]  }
 0x437   : > { %v2559_v12 = vpack.c.bf16 %v2505_v11, %v2505_v11  ;;  %5354 = vmatprep.subr.bf16.mxu1 %v5778_v2  ;;  %v5648_v10 = vld [vmem:[%s6630_s26 + $0x18] sm:$0xff]   ;;  %v5649_v11 = vld [vmem:[%s6630_s26] sm:$0xff]  }
 0x438   : > { %v5309_v13 = vpop.f32.mrf.mxu1  ;;  %v5314_v14 = vpop.f32.mrf.mxu0 }
 0x439   : > { %5337 = vmatmul.mubr.msk.bf16.vlgmr.msra.gmra.mxu0 %vm2131_vm3, %v2559_v12  ;;  %v5650_v12 = vld [vmem:[%s6630_s26 + $0x10] sm:$0xff]   ;;  %v1361_v13 = vld [vmem:[%s6631_s2] sm:$0xff] }
 0x43a   : > { %v2508_v15 = vpop.f32.mrf.mxu0  ;;  %v2551_v16 = vpop.f32.mrf.mxu1  ;;  %5350 = vmatprep.mubr.msk.bf16.mxu0 %vm5779_vm1, %v5778_v2  ;;  %5347 = vmatpush3.bf16.msra.mxu0 %v5639_v54  ;;  %v2796_v14 = vpack.c.bf16 %v1361_v13, %v1361_v13  ;;  %v4956_v54 = vld [vmem:[%s6634_s9 + $0x1] ss:$0 sm:$0xff]  ;;  %v4957_v13 = vld [vmem:[%s6634_s9 + $0x2] ss:$0 sm:$0xff] }
 0x43b   : > { %v2560_v17 = vpack.c.bf16 %v2551_v16, %v2551_v16  ;;  %5348 = vmatprep.subr.bf16.mxu0 %v5778_v2  ;;  %v5651_v15 = vld [vmem:[%s6630_s26 + $0x28] sm:$0xff]   ;;  %v5652_v16 = vld [vmem:[%s6630_s26 + $0x38] sm:$0xff]  }
 0x43c   : > { %v5315_v18 = vpop.f32.mrf.mxu0  ;;  %v5320_v19 = vpop.f32.mrf.mxu1 }
 0x43d   : > { %5343 = vmatmul.mubr.msk.bf16.vlgmr.msra.gmra.mxu1 %vm2131_vm3, %v2560_v17  ;;  %v5653_v17 = vld [vmem:[%s6630_s26 + $0x20] sm:$0xff]   ;;  %v5654_v18 = vld [vmem:[%s6630_s26 + $0x30] sm:$0xff]   ;;  %v5655_v19 = vld [vmem:[%s6632_s27 + $0x8] sm:$0xff]  }
 0x43e   : > { %v2554_v20 = vpop.f32.mrf.mxu1  ;;  %5358 = vmatprep.mubr.msk.bf16.mxu1 %vm5779_vm1, %v5778_v2  ;;  %5355 = vmatpush3.bf16.msra.mxu1 %v5640_v55 }
 0x43f   : > { %5356 = vmatprep.subr.bf16.mxu1 %v5778_v2  ;;  %5349 = vmatpush3.bf16.msra.mxu0 %v5641_v56  ;;  %v5656_v20 = vld [vmem:[%s6632_s27 + $0x18] sm:$0xff]  }
 0x440   : > { %v5321_v21 = vpop.f32.mrf.mxu1  ;;  %5362 = vmatprep.subr.bf16.mxu0 %v5778_v2 }
 0x441   : > { %v5657_v21 = vld [vmem:[%s6632_s27] sm:$0xff]  }
 0x4f1   : > { %v2605_v22 = vpop.f32.mrf.mxu0 }
 0x4f2   : > { %v2749_v31 = vsel %vm1419_vm2, %v2605_v22, 0.0  ;;  %v5658_v22 = vld [vmem:[%s6632_s27 + $0x10] sm:$0xff]  }
 0x4f3   : > { %v5326_v23 = vpop.f32.mrf.mxu0 }
 0x4f4   : > { %v5659_v23 = vld [vmem:[%s6632_s27 + $0x28] sm:$0xff]  }
 0x4f5   : > { %v2608_v24 = vpop.f32.mrf.mxu0  ;;  %v2651_v25 = vpop.f32.mrf.mxu1 }
 0x4f6   : > { %v2750_v28 = vsel %vm1419_vm2, %v2651_v25, 0.0  ;;  %v5660_v24 = vld [vmem:[%s6632_s27 + $0x38] sm:$0xff]   ;;  %v5661_v25 = vld [vmem:[%s6632_s27 + $0x20] sm:$0xff]  }
 0x4f7   : > { %v5327_v26 = vpop.f32.mrf.mxu0  ;;  %v5332_v27 = vpop.f32.mrf.mxu1  ;;  %v2751_v33 = vadd.f32 %v2750_v28, %v2749_v31 }
 0x4f8   : > { %v5662_v26 = vld [vmem:[%s6632_s27 + $0x30] sm:$0xff]  }
 0x4f9   : > { %v2654_v29 = vpop.f32.mrf.mxu1  ;;  %v2697_v30 = vpop.f32.mrf.mxu0 }
 0x4fa   : > { %v2752_v32 = vsel %vm1419_vm2, %v2697_v30, 0.0 }
 0x4fb   : > { %v5333_v34 = vpop.f32.mrf.mxu1  ;;  %v5338_v35 = vpop.f32.mrf.mxu0  ;;  %v2753_v36 = vadd.f32 %v2752_v32, %v2751_v33 }
 0x4fd   : > { %v2700_v37 = vpop.f32.mrf.mxu0  ;;  %v2743_v38 = vpop.f32.mrf.mxu1 }
 0x4fe   : > { %v2754_v39 = vsel %vm1419_vm2, %v2743_v38, 0.0 }
 0x4ff   : > { %v2755_v42 = vadd.f32 %v2754_v39, %v2753_v36  ;;  %v5339_v43 = vpop.f32.mrf.mxu0  ;;  %v5344_v44 = vpop.f32.mrf.mxu1 }
 0x500   : > { %v4971_v44 = vld [vmem:[%s6633_s13] ss:$0 sm:$0xff] }
 0x501   : > { %v2763_v46 = vadd.f32 %v4952_v41, %v2755_v42  ;;  %v2746_v47 = vpop.f32.mrf.mxu1 }
 0x503   : > { %v5345_v48 = vpop.f32.mrf.mxu1  ;;  %v2764_v49 = vadd.f32 %v2763_v46, %v6072_v6  ;;  %v5642_v6 = vld [vmem:[%s6625_s11 + $0x10] sm:$0xff]   ;;  %v4972_v46 = vld [vmem:[%s6633_s13 + $0x1] ss:$0 sm:$0xff] }
 0x504   : > { %5357 = vmatpush3.bf16.msra.mxu1 %v5642_v6 }
 0x505   : > { %v2767_v40 = vsel %vm1419_vm2, %v2764_v49, 0.0  ;;  %5370 = vmatprep.subr.bf16.mxu1 %v5778_v2 }
 0x506   : > { %2768 = vadd.xlane.f32.xlu0 %v2767_v40 }
 0x58f   : > { %v2769_v50 = vpop.xlane.xlu0 %2768 }
 0x590   : > { %v2771_v51 = vmul.f32 0.03125, %v2769_v50 }
 0x592   : > { %v2772_v45 = vsub.f32 %v2764_v49, %v2771_v51 }
 0x594   : > { %v2773_v52 = vmul.f32 %v2772_v45, %v2772_v45 }
 0x596   : > { %v2774_v53 = vsel %vm1419_vm2, %v2773_v52, 0.0 }
 0x597   : > { %2775 = vadd.xlane.f32.xlu1 %v2774_v53  ;;  %v4955_v53 = vld [vmem:[%s6634_s9] ss:$0 sm:$0xff] }
 0x620   : > { %v2776_v57 = vpop.xlane.xlu1 %2775 }
 0x621   : > { %v2777_v58 = vmul.f32 0.03125, %v2776_v57 }
 0x623   : > { %v2778_v59 = vadd.f32 1e-05, %v2777_v58 }
 0x625   : > { %5685 = vrsqrt.f32 %v2778_v59 }
 0x632   : > { %v5686_v60 = vpop.eup %5685 }
 0x633   : > { %v2780_v62 = vmul.f32 %v5686_v60, %v2772_v45  ;;  %v4973_v60 = vld [vmem:[%s6633_s13 + $0x2] ss:$0 sm:$0xff] }
 0x635   : > { %v2787_v0 = vmul.f32 %v4953_v61, %v2780_v62  ;;  %v4974_v61 = vld [vmem:[%s6633_s13 + $0x3] ss:$0 sm:$0xff] }
 0x637   : > { %v6282_v1 = vadd.f32 %v4954_v63, %v2787_v0 }
 0x639   : > { %v2795_v5 = vpack.c.bf16 %v6282_v1, %v6282_v1 }
 0x63b   : > { %5351 = vmatmul.mubr.msk.bf16.vlgmr.msra.gmra.mxu0 %vm1419_vm2, %v2795_v5  ;;  %5359 = vmatmul.mubr.msk.bf16.vlgmr.msra.gmra.mxu1 %vm1419_vm2, %v2795_v5 }
 0x63c   : > { %5363 = vmatpush3.bf16.msra.mxu0 %v5643_v3  ;;  %5371 = vmatpush3.bf16.msra.mxu1 %v5644_v4 }
 0x63d   : > { %5364 = vmatprep.subr.bf16.mxu0 %v5778_v2  ;;  %5372 = vmatprep.subr.bf16.mxu1 %v5778_v2 }
 0x63e   : > { %5366 = vmatprep.mubr.msk.bf16.mxu0 %vm5779_vm1, %v5778_v2  ;;  %5374 = vmatprep.mubr.msk.bf16.mxu1 %vm5779_vm1, %v5778_v2 }
 0x640   : > { %5365 = vmatpush3.bf16.msra.mxu0 %v5645_v7  ;;  %5373 = vmatpush3.bf16.msra.mxu1 %v5646_v8 }
 0x641   : > { %5378 = vmatprep.subr.bf16.mxu0 %v5778_v2  ;;  %5386 = vmatprep.subr.bf16.mxu1 %v5778_v2 }
 0x643   : > { %5367 = vmatmul.mubr.msk.bf16.vlgmr.msra.gmra.mxu0 %vm1419_vm2, %v2795_v5  ;;  %5375 = vmatmul.mubr.msk.bf16.vlgmr.msra.gmra.mxu1 %vm1419_vm2, %v2795_v5 }
 0x644   : > { %5379 = vmatpush3.bf16.msra.mxu0 %v5647_v9  ;;  %5387 = vmatpush3.bf16.msra.mxu1 %v5648_v10 }
 0x645   : > { %5380 = vmatprep.subr.bf16.mxu0 %v5778_v2  ;;  %5388 = vmatprep.subr.bf16.mxu1 %v5778_v2 }
 0x646   : > { %5382 = vmatprep.mubr.msk.bf16.mxu0 %vm5779_vm1, %v5778_v2  ;;  %5390 = vmatprep.mubr.msk.bf16.mxu1 %vm5779_vm1, %v5778_v2 }
 0x648   : > { %5381 = vmatpush3.bf16.msra.mxu0 %v5649_v11  ;;  %5389 = vmatpush3.bf16.msra.mxu1 %v5650_v12 }
 0x649   : > { %5394 = vmatprep.subr.bf16.mxu0 %v5778_v2  ;;  %5402 = vmatprep.subr.bf16.mxu1 %v5778_v2 }
 0x64b   : > { %5383 = vmatmul.mubr.msk.bf16.vlgmr.msra.gmra.mxu0 %vm1419_vm2, %v2796_v14  ;;  %5391 = vmatmul.mubr.msk.bf16.vlgmr.msra.gmra.mxu1 %vm1419_vm2, %v2796_v14 }
 0x64c   : > { %5395 = vmatpush3.bf16.msra.mxu0 %v5651_v15  ;;  %5403 = vmatpush3.bf16.msra.mxu1 %v5652_v16 }
 0x64d   : > { %5396 = vmatprep.subr.bf16.mxu0 %v5778_v2  ;;  %5404 = vmatprep.subr.bf16.mxu1 %v5778_v2 }
 0x64e   : > { %5398 = vmatprep.mubr.msk.bf16.mxu0 %vm5779_vm1, %v5778_v2  ;;  %5406 = vmatprep.mubr.msk.bf16.mxu1 %vm5779_vm1, %v5778_v2 }
 0x650   : > { %5397 = vmatpush3.bf16.msra.mxu0 %v5653_v17  ;;  %5405 = vmatpush3.bf16.msra.mxu1 %v5654_v18 }
 0x651   : > { %5410 = vmatprep.subr.bf16.mxu0 %v5778_v2  ;;  %5418 = vmatprep.subr.bf16.mxu1 %v5778_v2 }
 0x653   : > { %5399 = vmatmul.mubr.msk.bf16.vlgmr.msra.gmra.mxu0 %vm1419_vm2, %v2796_v14  ;;  %5407 = vmatmul.mubr.msk.bf16.vlgmr.msra.gmra.mxu1 %vm1419_vm2, %v2796_v14 }
 0x654   : > { %5414 = vmatprep.mubr.msk.bf16.mxu0 %vm5779_vm1, %v5778_v2  ;;  %5422 = vmatprep.mubr.msk.bf16.mxu1 %vm5779_vm1, %v5778_v2 }
 0x655   : > { %5411 = vmatpush3.bf16.msra.mxu0 %v5655_v19  ;;  %5419 = vmatpush3.bf16.msra.mxu1 %v5656_v20 }
 0x656   : > { %5412 = vmatprep.subr.bf16.mxu0 %v5778_v2  ;;  %5420 = vmatprep.subr.bf16.mxu1 %v5778_v2 }
 0x659   : > { %5413 = vmatpush3.bf16.msra.mxu0 %v5657_v21  ;;  %5421 = vmatpush3.bf16.msra.mxu1 %v5658_v22 }
 0x65a   : > { %5426 = vmatprep.subr.bf16.mxu0 %v5778_v2  ;;  %5434 = vmatprep.subr.bf16.mxu1 %v5778_v2 }
 0x65c   : > { %5415 = vmatmul.mubr.msk.bf16.vlgmr.msra.gmra.mxu0 %vm1419_vm2, %v2796_v14  ;;  %5423 = vmatmul.mubr.msk.bf16.vlgmr.msra.gmra.mxu1 %vm1419_vm2, %v2796_v14 }
 0x65d   : > { %5427 = vmatpush3.bf16.msra.mxu0 %v5659_v23  ;;  %5430 = vmatprep.mubr.msk.bf16.mxu0 %vm5779_vm1, %v5778_v2 }
 0x65e   : > { %5428 = vmatprep.subr.bf16.mxu0 %v5778_v2  ;;  %5435 = vmatpush3.bf16.msra.mxu1 %v5660_v24 }
 0x65f   : > { %5438 = vmatprep.mubr.msk.bf16.mxu1 %vm5779_vm1, %v5778_v2  ;;  %5436 = vmatprep.subr.bf16.mxu1 %v5778_v2 }
 0x661   : > { %5429 = vmatpush3.bf16.msra.mxu0 %v5661_v25  ;;  %v4987_v25 = vld [vmem:[%s6027_s14] ss:$0 sm:$0xff] }
 0x662   : > { %5442 = vmatprep.subr.bf16.mxu0 %v5778_v2  ;;  %5437 = vmatpush3.bf16.msra.mxu1 %v5662_v26 }
 0x663   : > { %5448 = vmatprep.subr.bf16.mxu1 %v5778_v2 }
 0x664   : > { %5431 = vmatmul.mubr.msk.bf16.vlgmr.msra.gmra.mxu0 %vm1419_vm2, %v2796_v14 }
 0x665   : > { %5444 = vmatprep.mubr.msk.bf16.mxu0 %vm5779_vm1, %v5778_v2  ;;  %5439 = vmatmul.mubr.msk.bf16.vlgmr.msra.gmra.mxu1 %vm1419_vm2, %v2796_v14  ;;  %v4958_v14 = vld [vmem:[%s6634_s9 + $0x3] ss:$0 sm:$0xff] }
 0x666   : > { %5450 = vmatprep.mubr.msk.bf16.mxu1 %vm5779_vm1, %v5778_v2 }
 0x6fb   : > { %v2890_v27 = vpop.f32.mrf.mxu0  ;;  %v2942_v28 = vpop.f32.mrf.mxu1 }
 0x6fc   : > { %v2891_v62 = vadd.f32 %v4955_v53, %v2890_v27  ;;  %v2943_v63 = vadd.f32 %v4956_v54, %v2942_v28  ;;  %v4988_v27 = vld [vmem:[%s6027_s14 + $0x1] ss:$0 sm:$0xff] }
 0x6fd   : > { %v5352_v29 = vpop.f32.mrf.mxu0  ;;  %v5360_v30 = vpop.f32.mrf.mxu1 }
 0x6fe   : > { %v3559_v9 = vpack.c.bf16 %v2891_v62, %v2891_v62  ;;  %v3560_v10 = vpack.c.bf16 %v2943_v63, %v2943_v63 }
 0x6ff   : > { %v2893_v31 = vpop.f32.mrf.mxu0  ;;  %v2945_v32 = vpop.f32.mrf.mxu1 }
 0x701   : > { %v5353_v33 = vpop.f32.mrf.mxu0  ;;  %v5361_v34 = vpop.f32.mrf.mxu1 }
 0x703   : > { %v2994_v35 = vpop.f32.mrf.mxu0  ;;  %v3046_v36 = vpop.f32.mrf.mxu1 }
 0x704   : > { %v2995_v21 = vadd.f32 %v4957_v13, %v2994_v35  ;;  %v3047_v22 = vadd.f32 %v4958_v14, %v3046_v36 }
 0x705   : > { %v5368_v37 = vpop.f32.mrf.mxu0  ;;  %v5376_v38 = vpop.f32.mrf.mxu1 }
 0x706   : > { %v3561_v23 = vpack.c.bf16 %v2995_v21, %v2995_v21  ;;  %v3562_v24 = vpack.c.bf16 %v3047_v22, %v3047_v22 }
 0x707   : > { %v2997_v39 = vpop.f32.mrf.mxu0  ;;  %v3049_v41 = vpop.f32.mrf.mxu1 }
 0x709   : > { %v5369_v42 = vpop.f32.mrf.mxu0  ;;  %v5377_v43 = vpop.f32.mrf.mxu1 }
 0x70b   : > { %v3145_v47 = vpop.f32.mrf.mxu0  ;;  %v3197_v48 = vpop.f32.mrf.mxu1 }
 0x70c   : > { %v3146_v49 = vadd.f32 %v4971_v44, %v3145_v47  ;;  %v3198_v40 = vadd.f32 %v4972_v46, %v3197_v48 }
 0x70d   : > { %v5384_v50 = vpop.f32.mrf.mxu0  ;;  %v5392_v51 = vpop.f32.mrf.mxu1 }
 0x70e   : > { %v3563_v45 = vpack.c.bf16 %v3146_v49, %v3146_v49  ;;  %v3564_v52 = vpack.c.bf16 %v3198_v40, %v3198_v40 }
 0x70f   : > { %v3148_v55 = vpop.f32.mrf.mxu0  ;;  %v3200_v56 = vpop.f32.mrf.mxu1 }
 0x710   : > { %v3571_v6 = vsel %vm2131_vm3, %v3563_v45, 0  ;;  %v3617_v57 = vsel %vm2131_vm3, %v3564_v52, 0 }
 0x711   : > { %v5385_v58 = vpop.f32.mrf.mxu0  ;;  %v5393_v59 = vpop.f32.mrf.mxu1  ;;  %5443 = vmatpush3.bf16.xpose.msra.mxu0 %v3571_v6  ;;  %5449 = vmatpush3.bf16.xpose.msra.mxu1 %v3617_v57 }
 0x712   : > { %5454 = vmatprep.subr.bf16.mxu0 %v5778_v2  ;;  %5460 = vmatprep.subr.bf16.mxu1 %v5778_v2 }
 0x713   : > { %v3249_v0 = vpop.f32.mrf.mxu0  ;;  %v3301_v3 = vpop.f32.mrf.mxu1 }
 0x714   : > { %v3250_v4 = vadd.f32 %v4973_v60, %v3249_v0  ;;  %v3302_v5 = vadd.f32 %v4974_v61, %v3301_v3 }
 0x715   : > { %v5400_v7 = vpop.f32.mrf.mxu0  ;;  %v5408_v8 = vpop.f32.mrf.mxu1 }
 0x716   : > { %v3565_v11 = vpack.c.bf16 %v3250_v4, %v3250_v4  ;;  %v3566_v12 = vpack.c.bf16 %v3302_v5, %v3302_v5 }
 0x717   : > { %v3252_v15 = vpop.f32.mrf.mxu0  ;;  %v3304_v16 = vpop.f32.mrf.mxu1 }
 0x718   : > { %v3663_v17 = vsel %vm2131_vm3, %v3565_v11, 0  ;;  %v3709_v18 = vsel %vm2131_vm3, %v3566_v12, 0  ;;  %5445 = vmatmul.mubr.msk.bf16.vlgmr.msra.gmra.mxu0 %vm2131_vm3, %v3559_v9  ;;  %5451 = vmatmul.mubr.msk.bf16.vlgmr.msra.gmra.mxu1 %vm2131_vm3, %v3560_v10 }
 0x719   : > { %v5401_v19 = vpop.f32.mrf.mxu0  ;;  %v5409_v20 = vpop.f32.mrf.mxu1  ;;  %5455 = vmatpush3.bf16.xpose.msra.mxu0 %v3663_v17  ;;  %5461 = vmatpush3.bf16.xpose.msra.mxu1 %v3709_v18 }
 0x71a   : > { %5456 = vmatprep.mubr.msk.bf16.mxu0 %vm5779_vm1, %v5778_v2  ;;  %5462 = vmatprep.mubr.msk.bf16.mxu1 %vm5779_vm1, %v5778_v2 }
 0x71b   : > { %5466 = vmatprep.subr.bf16.mxu0 %v5778_v2  ;;  %5472 = vmatprep.subr.bf16.mxu1 %v5778_v2 }
 0x71c   : > { %v3397_v26 = vpop.f32.mrf.mxu0  ;;  %v3449_v30 = vpop.f32.mrf.mxu1 }
 0x71d   : > { %v3398_v28 = vadd.f32 %v4987_v25, %v3397_v26  ;;  %v3450_v32 = vadd.f32 %v4988_v27, %v3449_v30 }
 0x71e   : > { %v5416_v29 = vpop.f32.mrf.mxu0  ;;  %v5424_v34 = vpop.f32.mrf.mxu1 }
 0x71f   : > { %v3803_v31 = vpack.c.bf16 %v3398_v28, %v3398_v28  ;;  %v3804_v36 = vpack.c.bf16 %v3450_v32, %v3450_v32 }
 0x720   : > { %5457 = vmatmul.mubr.msk.bf16.vlgmr.msra.gmra.mxu0 %vm2131_vm3, %v3561_v23  ;;  %5463 = vmatmul.mubr.msk.bf16.vlgmr.msra.gmra.mxu1 %vm2131_vm3, %v3562_v24  ;;  %v3400_v33 = vpop.f32.mrf.mxu0  ;;  %v3452_v38 = vpop.f32.mrf.mxu1 }
 0x721   : > { %5468 = vmatprep.mubr.msk.bf16.mxu0 %vm5779_vm1, %v5778_v2  ;;  %5474 = vmatprep.mubr.msk.bf16.mxu1 %vm5779_vm1, %v5778_v2  ;;  %v3811_v35 = vsel %vm2375_vm4, %v3803_v31, 0  ;;  %v3857_v39 = vsel %vm2375_vm4, %v3804_v36, 0  ;;  %v4990_v33 = vld [vmem:[%s6027_s14 + $0x3] ss:$0 sm:$0xff] }
 0x722   : > { %v5417_v37 = vpop.f32.mrf.mxu0  ;;  %5467 = vmatpush3.bf16.msra.mxu0 %v3811_v35  ;;  %v5425_v41 = vpop.f32.mrf.mxu1  ;;  %5473 = vmatpush3.bf16.msra.mxu1 %v3857_v39  ;;  %v4989_v35 = vld [vmem:[%s6027_s14 + $0x2] ss:$0 sm:$0xff] }
 0x723   : > { %5478 = vmatprep.subr.bf16.mxu0 %v5778_v2  ;;  %5484 = vmatprep.subr.bf16.mxu1 %v5778_v2 }
 0x724   : > { %v6396_v42 = vpop.f32.mrf.mxu0 }
 0x725   : > { %v6399_v44 = vpop.f32.mrf.mxu1  ;;  %v3502_v38 = vadd.f32 %v4989_v35, %v6396_v42 }
 0x726   : > { %v5432_v43 = vpop.f32.mrf.mxu0  ;;  %v3554_v37 = vadd.f32 %v4990_v33, %v6399_v44  ;;  %v3996_v44 = vld [vmem:[%s6030_s21 + $0x4] sm:$0xf] }
 0x727   : > { %v5440_v47 = vpop.f32.mrf.mxu1 }
 0x728   : > { %v3504_v46 = vpop.f32.mrf.mxu0  ;;  %v3806_v43 = vpack.c.bf16 %v3554_v37, %v3554_v37  ;;  %v3805_v47 = vpack.c.bf16 %v3502_v38, %v3502_v38 }
 0x729   : > { %v3556_v49 = vpop.f32.mrf.mxu1 }
 0x72a   : > { %v5433_v48 = vpop.f32.mrf.mxu0 }
 0x72b   : > { %v5441_v40 = vpop.f32.mrf.mxu1 }
 0x7d8   : > { %v3607_v50 = vpop.f32.mrf.mxu0  ;;  %v3653_v51 = vpop.f32.mrf.mxu1 }
 0x7d9   : > { %v3751_v45 = vmul.f32 0.35355338, %v3607_v50  ;;  %v3752_v52 = vmul.f32 0.35355338, %v3653_v51  ;;  %v3949_v50 = vsel %vm2375_vm4, %v3806_v43, 0  ;;  %v3903_v51 = vsel %vm2375_vm4, %v3805_v47, 0 }
 0x7da   : > { %v5446_v53 = vpop.f32.mrf.mxu0  ;;  %v5452_v54 = vpop.f32.mrf.mxu1 }
 0x7db   : > { %v3758_v55 = vsel %vm2131_vm3, %v3752_v52, -inf  ;;  %v3755_v56 = vsel %vm2131_vm3, %v3751_v45, -inf  ;;  %v3995_v53 = vld [vmem:[%s6030_s21] sm:$0xf] }
 0x7dc   : > { %3759 = vmax.xlane.f32.xlu1 %v3758_v55  ;;  %v3656_v6 = vpop.f32.mrf.mxu1  ;;  %3756 = vmax.xlane.f32.xlu0 %v3755_v56  ;;  %v3610_v57 = vpop.f32.mrf.mxu0  ;;  %v4049_v56 = vsel %vm2375_vm4, %v3996_v44, 0 }
 0x7dd   : > { %v4003_v57 = vsel %vm2375_vm4, %v3995_v53, 0  ;;  %v5663_v53 = vld [vmem:[%s6039_s5 + $0x8] sm:$0xff]  }
 0x7de   : > { %v5447_v58 = vpop.f32.mrf.mxu0  ;;  %v5453_v59 = vpop.f32.mrf.mxu1 }
 0x7df   : > { %v3998_v58 = vld [vmem:[%s6030_s21 + $0xc] sm:$0xf]  ;;  %v3997_v59 = vld [vmem:[%s6030_s21 + $0x8] sm:$0xf] }
 0x7e0   : > { %v3699_v60 = vpop.f32.mrf.mxu0  ;;  %v3745_v61 = vpop.f32.mrf.mxu1 }
 0x7e1   : > { %v3753_v62 = vmul.f32 0.35355338, %v3699_v60  ;;  %v3754_v63 = vmul.f32 0.35355338, %v3745_v61 }
 0x7e2   : > { %v5458_v0 = vpop.f32.mrf.mxu0  ;;  %v5464_v3 = vpop.f32.mrf.mxu1 }
 0x7e3   : > { %v3764_v4 = vsel %vm2131_vm3, %v3754_v63, -inf  ;;  %v3761_v5 = vsel %vm2131_vm3, %v3753_v62, -inf }
 0x7e4   : > { %3765 = vmax.xlane.f32.xlu1 %v3764_v4  ;;  %v3748_v7 = vpop.f32.mrf.mxu1  ;;  %3762 = vmax.xlane.f32.xlu0 %v3761_v5  ;;  %v3702_v8 = vpop.f32.mrf.mxu0  ;;  %v4095_v4 = vsel %vm2375_vm4, %v3997_v59, 0  ;;  %v5016_v59 = vld [vmem:[%s1322_s19] ss:$0 sm:$0xff] }
 0x7e6   : > { %v5459_v9 = vpop.f32.mrf.mxu0  ;;  %v5465_v10 = vpop.f32.mrf.mxu1 }
 0x865   : > { %v3760_v11 = vpop.xlane.xlu1 %3759  ;;  %v3757_v12 = vpop.xlane.xlu0 %3756 }
 0x866   : > { %v3768_v13 = vsub.f32 %v3752_v52, %v3760_v11  ;;  %v3767_v14 = vsub.f32 %v3751_v45, %v3757_v12 }
 0x868   : > { %v3773_v15 = vmul.f32 1.442695, %v3768_v13  ;;  %v3771_v16 = vmul.f32 1.442695, %v3767_v14 }
 0x86a   : > { %5687 = vpow2.f32 %v3773_v15 }
 0x86b   : > { %5689 = vpow2.f32 %v3771_v16 }
 0x86d   : > { %v3766_v17 = vpop.xlane.xlu1 %3765  ;;  %v3763_v18 = vpop.xlane.xlu0 %3762 }
 0x86e   : > { %v3770_v19 = vsub.f32 %v3754_v63, %v3766_v17  ;;  %v3769_v20 = vsub.f32 %v3753_v62, %v3763_v18  ;;  %v4141_v63 = vsel %vm2375_vm4, %v3998_v58, 0 }
 0x870   : > { %v3777_v21 = vmul.f32 1.442695, %v3770_v19  ;;  %v3775_v22 = vmul.f32 1.442695, %v3769_v20 }
 0x872   : > { %5691 = vpow2.f32 %v3777_v21 }
 0x873   : > { %5693 = vpow2.f32 %v3775_v22 }
 0x877   : > { %v5688_v23 = vpop.eup %5687 }
 0x878   : > { %v5690_v24 = vpop.eup %5689  ;;  %v3782_v25 = vsel %vm2131_vm3, %v5688_v23, 0.0 }
 0x879   : > { %3783 = vadd.xlane.f32.xlu1 %v3782_v25  ;;  %v3779_v26 = vsel %vm2131_vm3, %v5690_v24, 0.0 }
 0x87a   : > { %3780 = vadd.xlane.f32.xlu0 %v3779_v26 }
 0x87f   : > { %v5692_v27 = vpop.eup %5691 }
 0x880   : > { %v5694_v28 = vpop.eup %5693  ;;  %v3788_v29 = vsel %vm2131_vm3, %v5692_v27, 0.0 }
 0x881   : > { %3789 = vadd.xlane.f32.xlu1 %v3788_v29  ;;  %v3785_v30 = vsel %vm2131_vm3, %v5694_v28, 0.0 }
 0x882   : > { %3786 = vadd.xlane.f32.xlu0 %v3785_v30 }
 0x902   : > { %v3784_v31 = vpop.xlane.xlu1 %3783 }
 0x903   : > { %5695 = vrcp.f32 %v3784_v31  ;;  %v3781_v32 = vpop.xlane.xlu0 %3780 }
 0x904   : > { %5697 = vrcp.f32 %v3781_v32 }
 0x90a   : > { %v3790_v34 = vpop.xlane.xlu1 %3789 }
 0x90b   : > { %5699 = vrcp.f32 %v3790_v34  ;;  %v3787_v36 = vpop.xlane.xlu0 %3786 }
 0x90c   : > { %5701 = vrcp.f32 %v3787_v36 }
 0x910   : > { %v5696_v39 = vpop.eup %5695 }
 0x911   : > { %v5698_v41 = vpop.eup %5697  ;;  %v3796_v46 = vmul.f32 %v5696_v39, %v5688_v23  ;;  %v5015_v39 = vld [vmem:[%s1319_s10] ss:$0 sm:$0xff] }
 0x912   : > { %v3795_v48 = vmul.f32 %v5698_v41, %v5690_v24 }
 0x913   : > { %v3800_v49 = vpack.c.bf16 %v3796_v46, %v3796_v46 }
 0x914   : > { %v3799_v40 = vpack.c.bf16 %v3795_v48, %v3795_v48 }
 0x915   : > { %5475 = vmatmul.mubr.msk.bf16.vlgmr.msra.gmra.mxu1 %vm2131_vm3, %v3800_v49 }
 0x916   : > { %5469 = vmatmul.mubr.msk.bf16.vlgmr.msra.gmra.mxu0 %vm2131_vm3, %v3799_v40  ;;  %5485 = vmatpush3.bf16.msra.mxu1 %v3949_v50 }
 0x917   : > { %5479 = vmatpush3.bf16.msra.mxu0 %v3903_v51  ;;  %5480 = vmatprep.mubr.msk.bf16.mxu0 %vm5779_vm1, %v5778_v2 }
 0x918   : > { %v5700_v42 = vpop.eup %5699  ;;  %5486 = vmatprep.mubr.msk.bf16.mxu1 %vm5779_vm1, %v5778_v2  ;;  %5490 = vmatprep.subr.bf16.mxu0 %v5778_v2 }
 0x919   : > { %v5702_v45 = vpop.eup %5701  ;;  %v3798_v52 = vmul.f32 %v5700_v42, %v5692_v27  ;;  %5496 = vmatprep.subr.bf16.mxu1 %v5778_v2 }
 0x91a   : > { %v3797_v54 = vmul.f32 %v5702_v45, %v5694_v28 }
 0x91b   : > { %v3802_v55 = vpack.c.bf16 %v3798_v52, %v3798_v52 }
 0x91c   : > { %v3801_v6 = vpack.c.bf16 %v3797_v54, %v3797_v54  ;;  %v5664_v54 = vld [vmem:[%s6039_s5] sm:$0xff]  }
 0x91d   : > { %5487 = vmatmul.mubr.msk.bf16.vlgmr.msra.gmra.mxu1 %vm2131_vm3, %v3802_v55  ;;  %v5666_v55 = vld [vmem:[%s6047_s28 + $0x10] sm:$0xff]  }
 0x91e   : > { %5481 = vmatmul.mubr.msk.bf16.vlgmr.msra.gmra.mxu0 %vm2131_vm3, %v3801_v6  ;;  %5497 = vmatpush3.bf16.msra.mxu1 %v4049_v56 }
 0x91f   : > { %5491 = vmatpush3.bf16.msra.mxu0 %v4003_v57  ;;  %5492 = vmatprep.mubr.msk.bf16.mxu0 %vm5779_vm1, %v5778_v2 }
 0x920   : > { %5498 = vmatprep.mubr.msk.bf16.mxu1 %vm5779_vm1, %v5778_v2  ;;  %5502 = vmatprep.subr.bf16.mxu0 %v5778_v2 }
 0x921   : > { %5508 = vmatprep.subr.bf16.mxu1 %v5778_v2 }
 0x9d5   : > { %v3893_v60 = vpop.f32.mrf.mxu1 }
 0x9d6   : > { %v3847_v61 = vpop.f32.mrf.mxu0  ;;  %v3992_v62 = vpack.c.bf16 %v3893_v60, %v3893_v60 }
 0x9d7   : > { %v3991_v0 = vpack.c.bf16 %v3847_v61, %v3847_v61  ;;  %v5476_v3 = vpop.f32.mrf.mxu1  ;;  %v5017_v61 = vld [vmem:[%s1325_s24] ss:$0 sm:$0xff]  ;;  %s6641_s24 = sld [smem:[#allocation32_spill]] }
 0x9d8   : > { %v5470_v5 = vpop.f32.mrf.mxu0  ;;  %5499 = vmatmul.mubr.msk.bf16.vlgmr.msra.gmra.mxu1 %vm2131_vm3, %v3992_v62  ;;  %v5667_v3 = vld [vmem:[%s6047_s28 + $0x8] sm:$0xff]  }
 0x9d9   : > { %5493 = vmatmul.mubr.msk.bf16.vlgmr.msra.gmra.mxu0 %vm2131_vm3, %v3991_v0  ;;  %v3896_v7 = vpop.f32.mrf.mxu1  ;;  %5509 = vmatpush3.bf16.msra.mxu1 %v4141_v63  ;;  %v5018_v5 = vld [vmem:[%s1333_s30] ss:$0 sm:$0xff] }
 0x9da   : > { %v3850_v8 = vpop.f32.mrf.mxu0  ;;  %5503 = vmatpush3.bf16.msra.mxu0 %v4095_v4  ;;  %5504 = vmatprep.mubr.msk.bf16.mxu0 %vm5779_vm1, %v5778_v2  ;;  %v5668_v4 = vld [vmem:[%s6047_s28] sm:$0xff]  }
 0x9db   : > { %v5477_v9 = vpop.f32.mrf.mxu1  ;;  %5510 = vmatprep.mubr.msk.bf16.mxu1 %vm5779_vm1, %v5778_v2  ;;  %5514 = vmatprep.subr.bf16.mxu0 %v5778_v2 }
 0x9dc   : > { %v5471_v10 = vpop.f32.mrf.mxu0  ;;  %5522 = vmatprep.subr.bf16.mxu1 %v5778_v2 }
 0x9dd   : > { %v3985_v11 = vpop.f32.mrf.mxu1  ;;  %p5030_p8 = scmp.ne.s32.totalorder %s6641_s24, 1 }
 0x9de   : > { %v3939_v12 = vpop.f32.mrf.mxu0  ;;  %v3994_v13 = vpack.c.bf16 %v3985_v11, %v3985_v11  ;;  %s6642_s30 = sld [smem:[#allocation29_spill]] (!%p5030_p8) }
 0x9df   : > { %v3993_v14 = vpack.c.bf16 %v3939_v12, %v3939_v12  ;;  %v5488_v15 = vpop.f32.mrf.mxu1 }
 0x9e0   : > { %v5482_v16 = vpop.f32.mrf.mxu0  ;;  %5511 = vmatmul.mubr.msk.bf16.vlgmr.msra.gmra.mxu1 %vm2131_vm3, %v3994_v13 }
 0x9e1   : > { %5505 = vmatmul.mubr.msk.bf16.vlgmr.msra.gmra.mxu0 %vm2131_vm3, %v3993_v14  ;;  %v3988_v17 = vpop.f32.mrf.mxu1  ;;  %5530 = vmatprep.mubr.msk.bf16.mxu1 %vm5779_vm1, %v5778_v2  ;;  %v5022_v14 = vld [vmem:[%s1341_s6] ss:$0 sm:$0xff]  ;;  %s6643_s6 = sld [smem:[#allocation30_spill]] (!%p5030_p8) }
 0x9e2   : > { %v3942_v18 = vpop.f32.mrf.mxu0  ;;  %5518 = vmatprep.mubr.msk.bf16.mxu0 %vm5779_vm1, %v5778_v2  ;;  %5515 = vmatpush3.bf16.msra.mxu0 %v5663_v53 }
 0x9e3   : > { %v5489_v19 = vpop.f32.mrf.mxu1  ;;  %5516 = vmatprep.subr.bf16.mxu0 %v5778_v2 }
 0x9e4   : > { %v5483_v20 = vpop.f32.mrf.mxu0 }
 0x9e6   : > { %5517 = vmatpush3.bf16.msra.mxu0 %v5664_v54 }
 0xa98   : > { %v4085_v21 = vpop.f32.mrf.mxu1 }
 0xa99   : > { %v4039_v22 = vpop.f32.mrf.mxu0  ;;  %v4184_v28 = vsel %vm1419_vm2, %v4085_v21, 0.0 }
 0xa9a   : > { %v5500_v23 = vpop.f32.mrf.mxu1  ;;  %v4183_v27 = vsel %vm1419_vm2, %v4039_v22, 0.0 }
 0xa9b   : > { %v5494_v24 = vpop.f32.mrf.mxu0  ;;  %v4185_v32 = vadd.f32 %v4184_v28, %v4183_v27 }
 0xa9c   : > { %v4088_v25 = vpop.f32.mrf.mxu1 }
 0xa9d   : > { %v4042_v26 = vpop.f32.mrf.mxu0 }
 0xa9e   : > { %v5501_v29 = vpop.f32.mrf.mxu1 }
 0xa9f   : > { %v5495_v30 = vpop.f32.mrf.mxu0 }
 0xaa0   : > { %v4177_v31 = vpop.f32.mrf.mxu1  ;;  %v5028_v30 = vld [vmem:[%s1344_s17] ss:$0 sm:$0xff] }
 0xaa1   : > { %v4131_v33 = vpop.f32.mrf.mxu0  ;;  %v4188_v38 = vsel %vm1419_vm2, %v4177_v31, 0.0 }
 0xaa2   : > { %v4186_v34 = vsel %vm1419_vm2, %v4131_v33, 0.0  ;;  %v5512_v35 = vpop.f32.mrf.mxu1 }
 0xaa3   : > { %v4187_v36 = vadd.f32 %v4186_v34, %v4185_v32  ;;  %v5506_v37 = vpop.f32.mrf.mxu0  ;;  %v5029_v32 = vld [vmem:[%s1347_s1] ss:$0 sm:$0xff] }
 0xaa4   : > { %v4180_v41 = vpop.f32.mrf.mxu1 }
 0xaa5   : > { %v4189_v43 = vadd.f32 %v4188_v38, %v4187_v36  ;;  %v4134_v46 = vpop.f32.mrf.mxu0 }
 0xaa6   : > { %v5513_v47 = vpop.f32.mrf.mxu1 }
 0xaa7   : > { %v4197_v48 = vadd.f32 %v5015_v39, %v4189_v43  ;;  %v5507_v49 = vpop.f32.mrf.mxu0 }
 0xaa9   : > { %v4198_v40 = vadd.f32 %v4197_v48, %v6282_v1  ;;  %v5665_v1 = vld [vmem:[%s6047_s28 + $0x18] sm:$0xff]  }
 0xaaa   : > { %5523 = vmatpush3.bf16.msra.mxu1 %v5665_v1 }
 0xaab   : > { %v4201_v50 = vsel %vm1419_vm2, %v4198_v40, 0.0  ;;  %5524 = vmatprep.subr.bf16.mxu1 %v5778_v2 }
 0xaac   : > { %4202 = vadd.xlane.f32.xlu0 %v4201_v50 }
 0xaae   : > { %5525 = vmatpush3.bf16.msra.mxu1 %v5666_v55 }
 0xaaf   : > { %5526 = vmatprep.subr.bf16.mxu1 %v5778_v2 }
 0xab2   : > { %5527 = vmatpush3.bf16.msra.mxu1 %v5667_v3 }
 0xab3   : > { %5528 = vmatprep.subr.bf16.mxu1 %v5778_v2 }
 0xab6   : > { %5529 = vmatpush3.bf16.msra.mxu1 %v5668_v4 }
 0xb35   : > { %v4203_v51 = vpop.xlane.xlu0 %4202 }
 0xb36   : > { %v4204_v42 = vmul.f32 0.03125, %v4203_v51 }
 0xb38   : > { %v4205_v44 = vsub.f32 %v4198_v40, %v4204_v42 }
 0xb3a   : > { %v4206_v45 = vmul.f32 %v4205_v44, %v4205_v44 }
 0xb3c   : > { %v4207_v52 = vsel %vm1419_vm2, %v4206_v45, 0.0 }
 0xb3d   : > { %4208 = vadd.xlane.f32.xlu1 %v4207_v52 }
 0xbc6   : > { %v4209_v56 = vpop.xlane.xlu1 %4208 }
 0xbc7   : > { %v4210_v6 = vmul.f32 0.03125, %v4209_v56 }
 0xbc9   : > { %v4211_v57 = vadd.f32 1e-05, %v4210_v6 }
 0xbcb   : > { %5703 = vrsqrt.f32 %v4211_v57 }
 0xbd8   : > { %v5704_v58 = vpop.eup %5703 }
 0xbd9   : > { %v4213_v60 = vmul.f32 %v5704_v58, %v4205_v44 }
 0xbdb   : > { %v4220_v62 = vmul.f32 %v5016_v59, %v4213_v60 }
 0xbdd   : > { %v4227_v63 = vadd.f32 %v5017_v61, %v4220_v62 }
 0xbdf   : > { %v4228_v0 = vpack.c.bf16 %v4227_v63, %v4227_v63 }
 0xbe1   : > { %5519 = vmatmul.mubr.msk.bf16.vlgmr.msra.gmra.mxu0 %vm1419_vm2, %v4228_v0 }
 0xca1   : > { %v4289_v7 = vpop.f32.mrf.mxu0 }
 0xca2   : > { %v4290_v8 = vadd.f32 %v5018_v5, %v4289_v7 }
 0xca3   : > { %v5520_v9 = vpop.f32.mrf.mxu0 }
 0xca4   : > { %v4295_v10 = vmax.f32 %v4290_v8, 0.0 }
 0xca5   : > { %v4292_v11 = vpop.f32.mrf.mxu0 }
 0xca6   : > { %v4296_v12 = vpack.c.bf16 %v4295_v10, %v4295_v10 }
 0xca7   : > { %v5521_v13 = vpop.f32.mrf.mxu0 }
 0xca8   : > { %5531 = vmatmul.mubr.msk.bf16.vlgmr.msra.gmra.mxu1 %vm4336_vm5, %v4296_v12 }
 0xd68   : > { %v4374_v15 = vpop.f32.mrf.mxu1 }
 0xd69   : > { %v4375_v16 = vadd.f32 %v5022_v14, %v4374_v15 }
 0xd6a   : > { %v5532_v17 = vpop.f32.mrf.mxu1 }
 0xd6b   : > { %v4380_v18 = vadd.f32 %v4375_v16, %v4227_v63 }
 0xd6c   : > { %v4377_v2 = vpop.f32.mrf.mxu1 }
 0xd6d   : > { %v4383_v19 = vsel %vm1419_vm2, %v4380_v18, 0.0 }
 0xd6e   : > { %4384 = vadd.xlane.f32.xlu0 %v4383_v19  ;;  %v5533_v20 = vpop.f32.mrf.mxu1 }
 0xdf7   : > { %v4385_v21 = vpop.xlane.xlu0 %4384 }
 0xdf8   : > { %v4386_v22 = vmul.f32 0.03125, %v4385_v21 }
 0xdfa   : > { %v4387_v23 = vsub.f32 %v4380_v18, %v4386_v22 }
 0xdfc   : > { %v4388_v24 = vmul.f32 %v4387_v23, %v4387_v23 }
 0xdfe   : > { %v4389_v25 = vsel %vm1419_vm2, %v4388_v24, 0.0 }
 0xdff   : > { %4390 = vadd.xlane.f32.xlu1 %v4389_v25 }
 0xe88   : > { %v4391_v26 = vpop.xlane.xlu1 %4390 }
 0xe89   : > { %v4392_v27 = vmul.f32 0.03125, %v4391_v26 }
 0xe8b   : > { %v4393_v28 = vadd.f32 1e-05, %v4392_v27 }
 0xe8d   : > { %5705 = vrsqrt.f32 %v4393_v28 }
 0xe9a   : > { %v5706_v29 = vpop.eup %5705 }
 0xe9b   : > { %v4395_v31 = vmul.f32 %v5706_v29, %v4387_v23 }
 0xe9d   : > { %v4402_v33 = vmul.f32 %v5028_v30, %v4395_v31  ;;  %4414 = sbr.rel (%p5030_p8) target bundleno = 3954 (0xf72), region = 144 }
 0xe9f   : > { %v4409_v34 = vadd.f32 %v5029_v32, %v4402_v33 }
 0xea1   : > { %4410 = vst.msk [vmem:[#allocation2] sm:$0xff] %vm1419_vm2, %v4409_v34 }
 0xea2   : > { %v5707_v35 = vld [vmem:[%s6642_s30 + $0x8] sm:$0xff]   ;;  %v5780_v36 = vmov 0.0   ;;  %v5708_v37 = vld [vmem:[%s6642_s30] sm:$0xff]   ;;  %vm5781_vm6 = vmmov 0   ;;  %v4415_v38 = vpack.c.bf16 %v4409_v34, %v4409_v34 }
 0xea3   : > { %5534 = vmatprep.subr.bf16.mxu0 %v5780_v36  ;;  %5538 = vmatprep.mubr.msk.bf16.mxu0 %vm5781_vm6, %v5780_v36  ;;  %v5031_v39 = vld [vmem:[%s6643_s6] ss:$0 sm:$0xff] }
 0xea4   : > { %5535 = vmatpush3.bf16.msra.mxu0 %v5707_v35 }
 0xea5   : > { %5536 = vmatprep.subr.bf16.mxu0 %v5780_v36 }
 0xea8   : > { %5537 = vmatpush3.bf16.msra.mxu0 %v5708_v37 }
 0xeab   : > { %5539 = vmatmul.mubr.msk.bf16.vlgmr.msra.gmra.mxu0 %vm1419_vm2, %v4415_v38 }
 0xf6b   : > { %v4476_v41 = vpop.f32.mrf.mxu0 }
 0xf6c   : > { %v4477_v43 = vadd.f32 %v5031_v39, %v4476_v41 }
 0xf6d   : > { %v5540_v46 = vpop.f32.mrf.mxu0 }
 0xf6e   : > { %4482 = vst [vmem:[%s6056_s18] sm:$0xff] %v4477_v43 }
 0xf6f   : > { %v4479_v47 = vpop.f32.mrf.mxu0 }
 0xf71   : > { %v5541_v48 = vpop.f32.mrf.mxu0 }
 0xf72 PF: > { %s6644_s17 = sld [smem:[#allocation35_spill]] }
 0xf73   : > { %s6645_s7 = sld [smem:[#allocation33_spill]] }
 0xf74   : > { %s6646_s10 = sld [smem:[#allocation34_spill]] }
 0xf75   : > { %s6647_s11 = sld [smem:[#allocation36_spill]] }
 0xf76   : > { %s6648_s15 = sld [smem:[#allocation37_spill]] }
 0xf78   : > { %s69_s16 = sadd.s32 1, %s6644_s17  }
 0xf79   : > { %p66_p9 = scmp.ge.s32.totalorder %s69_s16, 6  }
 0xf7b   :  { %68 = sbr.rel (!%p66_p9) target bundleno = 67 (0x43), region = 281 }

</bundles_post_ra>
